<compile_context>
chip_gen: v5e
topology: v5e:2x2
jax: 0.10.0
libtpu: 0.0.40
codegen_flags: <defaults>
</compile_context>

<pallas_src>
import functools
import math

import numpy as np
import jax
import jax.numpy as jnp
from jax.experimental import pallas as pl
from jax.experimental.pallas import tpu as pltpu


# ------------------------------ Pallas kernel -------------------------------

def _fused_kernel(x_ref, gamma_ref, beta_ref, wqT_ref, bq_ref, wkT_ref,
                  wvT_ref, rszb_ref, maskv_ref, seg2head_ref, head2feat_ref,
                  woT_ref, bo_ref, o_ref, *, bs, l, new_l, heads):
    # ---- stack the bs batch slices along sublanes: (bs*L, Din)
    if bs == 1:
        xs = x_ref[0]
    else:
        xs = jnp.concatenate([x_ref[j] for j in range(bs)], axis=0)

    # ---- LayerNorm (f32 VPU math; biased variance + eps=1e-5 == nn.LayerNorm)
    mean = jnp.mean(xs, axis=-1, keepdims=True)
    var = jnp.mean((xs - mean) ** 2, axis=-1, keepdims=True)
    xn = (xs - mean) * jax.lax.rsqrt(var + 1e-5)
    xn = xn * gamma_ref[...] + beta_ref[...]                      # (bs*L, Din)

    # ---- q/k/v projections shared across the pair (bf16 MXU, f32 accum).
    #      1/sqrt(dh) is folded into wqT/bq on the host.
    xn_bf = xn.astype(jnp.bfloat16)
    q = jnp.dot(xn_bf, wqT_ref[...],
                preferred_element_type=jnp.float32) + bq_ref[...]   # (bs*L, E)
    k = jnp.dot(xn_bf, wkT_ref[...], preferred_element_type=jnp.float32)
    v = jnp.dot(xn_bf, wvT_ref[...], preferred_element_type=jnp.float32)

    # ---- spatial resize of q: one bf16 matmul with the bs-block-diagonal
    #      interpolation matrix (keeps the pair independent).
    q_new = jnp.dot(rszb_ref[...], q.astype(jnp.bfloat16),
                    preferred_element_type=jnp.float32)             # (bs*Lq, E)

    maskv = maskv_ref[...]                                          # (H*L, E) bf16
    outs = []
    for j in range(bs):
        kj = k[j * l:(j + 1) * l].astype(jnp.bfloat16)              # (L, E)
        vj = v[j * l:(j + 1) * l].astype(jnp.bfloat16)
        qj = q_new[j * new_l:(j + 1) * new_l].astype(jnp.bfloat16)  # (Lq, E)

        # head spread = pure sublane replication + 0/1 mask on the VPU
        # (no MXU matmul, no (H*L, L) constant).
        if heads == 1:
            krep, vrep = kj, vj
        else:
            krep = jnp.concatenate([kj] * heads, axis=0)            # (H*L, E)
            vrep = jnp.concatenate([vj] * heads, axis=0)
        kblk = krep * maskv
        vblk = vrep * maskv

        # lane-dense packed scores: s[q, h*L + t] = <q_h[q], k_h[t]> / sqrt(dh)
        s = jnp.einsum('qe,ce->qc', qj, kblk,
                       preferred_element_type=jnp.float32)          # (Lq, H*L)

        # global row max is an algebraically valid stabilizer; exp stays
        # lane-dense (EUP on 128 lanes).
        m = jnp.max(s, axis=-1, keepdims=True)
        ex = jnp.exp(s - m).astype(jnp.bfloat16)

        # per-head denominator via a skinny 0/1 bf16 matmul; normalization is
        # folded AFTER the PV matmul (valid since vblk is block-diagonal).
        denom_h = jnp.dot(ex, seg2head_ref[...],
                          preferred_element_type=jnp.float32)       # (Lq, H)
        inv_h = pl.reciprocal(jnp.maximum(denom_h, 1e-20), approx=True)
        o_un = jnp.dot(ex, vblk, preferred_element_type=jnp.float32)   # (Lq, E)
        inv_e = jnp.dot(inv_h.astype(jnp.bfloat16), head2feat_ref[...],
                        preferred_element_type=jnp.float32)         # (Lq, E)
        outs.append((o_un * inv_e).astype(jnp.bfloat16))

    # ---- output projection once for the whole pair, then lane-concatenate
    #      the per-batch (Lq, E) results into a lane-dense (Lq, bs*E) slab.
    o_all = outs[0] if bs == 1 else jnp.concatenate(outs, axis=0)   # (bs*Lq, E)
    proj = jnp.dot(o_all, woT_ref[...],
                   preferred_element_type=jnp.float32) + bo_ref[...]
    if bs == 1:
        out = proj
    else:
        out = jnp.concatenate(
            [proj[j * new_l:(j + 1) * new_l] for j in range(bs)], axis=-1)
    o_ref[0] = out


# --------------------------- host-side constants -----------------------------

def _resize_matrix(h, w, scale_factor, mode):
    """(out_h*out_w, h*w) matrix reproducing F.interpolate (nearest / bilinear,
    align_corners=False) on row-major (h, w) flattened tokens."""
    out_h = int(h * scale_factor)
    out_w = int(w * scale_factor)

    def axis_mat(out_size, in_size):
        m = np.zeros((out_size, in_size), np.float32)
        if mode == "nearest":
            for o in range(out_size):
                src = min(int(math.floor(o * (in_size / out_size))), in_size - 1)
                m[o, src] = 1.0
        else:  # bilinear, align_corners=False (half-pixel centers, clamped >= 0)
            for o in range(out_size):
                src = max((o + 0.5) * (in_size / out_size) - 0.5, 0.0)
                i0 = min(int(math.floor(src)), in_size - 1)
                i1 = min(i0 + 1, in_size - 1)
                w1 = src - i0
                m[o, i0] += 1.0 - w1
                m[o, i1] += w1
        return m

    return np.kron(axis_mat(out_h, h), axis_mat(out_w, w))


# -------------------------------- wrapper ------------------------------------

def attention_resample(x, params, *, scale_factor, heads):
    b, l, d = x.shape
    out_dim = params["wq"].shape[0]
    assert out_dim % heads == 0, "out_dim must be divisible by heads"
    hw = int(round(l ** 0.5))
    assert hw * hw == l, "sequence length must be a perfect square"
    dh = out_dim // heads
    new_l = int(l * scale_factor * scale_factor)
    mode = "nearest" if scale_factor < 1 else "bilinear"
    hl = heads * l
    bs = 2 if b % 2 == 0 else 1     # pair batches -> lane-dense output store

    # weights: bf16 operands at the MXU boundary; biases / norm params stay f32.
    # Softmax scale 1/sqrt(dh) folded into wq and bq (free host-side pre-scale).
    scale = 1.0 / math.sqrt(dh)
    wqT = (params["wq"] * scale).T.astype(jnp.bfloat16)          # (Din, E)
    bq = (params["bq"] * scale)[None, :].astype(jnp.float32)
    wkT = params["wkv"][:out_dim].T.astype(jnp.bfloat16)         # (Din, E)
    wvT = params["wkv"][out_dim:].T.astype(jnp.bfloat16)         # (Din, E)
    woT = params["wo"].T.astype(jnp.bfloat16)                    # (E, E)
    gamma = params["gamma"][None, :].astype(jnp.float32)
    beta = params["beta"][None, :].astype(jnp.float32)
    bo = params["bo"][None, :].astype(jnp.float32)

    # host-precomputed bf16 constants (interp weights / 0-1 masks are exact)
    rsz = _resize_matrix(hw, hw, scale_factor, mode)                       # (new_l, l)
    rszb = jnp.asarray(np.kron(np.eye(bs, dtype=np.float32), rsz),
                       dtype=jnp.bfloat16)                                 # (bs*new_l, bs*l)
    c_seg = np.arange(hl) // l          # packed lane position -> head
    e_seg = np.arange(out_dim) // dh    # feature column       -> head
    maskv = jnp.asarray(c_seg[:, None] == e_seg[None, :], dtype=jnp.bfloat16)          # (hl, E)
    seg2head = jnp.asarray(c_seg[:, None] == np.arange(heads)[None, :],
                           dtype=jnp.bfloat16)                                         # (hl, H)
    head2feat = jnp.asarray(np.arange(heads)[:, None] == e_seg[None, :],
                            dtype=jnp.bfloat16)                                        # (H, E)

    def rep(arr):
        nd = arr.ndim
        return pl.BlockSpec(arr.shape, lambda i: (0,) * nd)

    kernel = functools.partial(_fused_kernel, bs=bs, l=l, new_l=new_l, heads=heads)
    out = pl.pallas_call(
        kernel,
        out_shape=jax.ShapeDtypeStruct((b // bs, new_l, bs * out_dim), jnp.float32),
        grid=(b // bs,),
        in_specs=[
            pl.BlockSpec((bs, l, d), lambda i: (i, 0, 0)),
            rep(gamma), rep(beta), rep(wqT), rep(bq), rep(wkT), rep(wvT),
            rep(rszb), rep(maskv), rep(seg2head), rep(head2feat),
            rep(woT), rep(bo),
        ],
        out_specs=pl.BlockSpec((1, new_l, bs * out_dim), lambda i: (i, 0, 0)),
        compiler_params=pltpu.CompilerParams(
            dimension_semantics=("parallel",),          # batch pairs across TCs
            vmem_limit_bytes=32 * 1024 * 1024),
    )(x, gamma, beta, wqT, bq, wkT, wvT, rszb, maskv, seg2head, head2feat, woT, bo)

    # un-interleave the paired lane-blocks back into (B, new_l, E)
    out = out.reshape(b // bs, new_l, bs, out_dim).transpose(0, 2, 1, 3)
    return out.reshape(b, new_l, out_dim)


# --------------------------- pure-JAX f32 reference --------------------------

def _reference(x, params, *, scale_factor, heads):
    b, l, d = x.shape
    out_dim = params["wq"].shape[0]
    hw = int(round(l ** 0.5))
    dh = out_dim // heads
    mode = "nearest" if scale_factor < 1 else "bilinear"
    mean = jnp.mean(x, axis=-1, keepdims=True)
    var = jnp.mean((x - mean) ** 2, axis=-1, keepdims=True)
    xn = (x - mean) / jnp.sqrt(var + 1e-5) * params["gamma"] + params["beta"]
    q = xn @ params["wq"].T + params["bq"]
    kv = xn @ params["wkv"].T
    k, v = kv[..., :out_dim], kv[..., out_dim:]
    rsz = jnp.asarray(_resize_matrix(hw, hw, scale_factor, mode))
    q = jnp.einsum('ol,bld->bod', rsz, q)
    new_l = q.shape[1]
    qh = q.reshape(b, new_l, heads, dh).transpose(0, 2, 1, 3)
    kh = k.reshape(b, l, heads, dh).transpose(0, 2, 1, 3)
    vh = v.reshape(b, l, heads, dh).transpose(0, 2, 1, 3)
    s = jnp.einsum('bhqd,bhkd->bhqk', qh, kh) / math.sqrt(dh)
    p = jax.nn.softmax(s, axis=-1)
    o = jnp.einsum('bhqk,bhkd->bhqd', p, vh).transpose(0, 2, 1, 3)
    return o.reshape(b, new_l, out_dim) @ params["wo"].T + params["bo"]


# ---------------------------------- main -------------------------------------

if __name__ == "__main__":
    # Module config: scale_factor=2 (bilinear branch), in_dim=32, out_dim=64, heads=8.
    scale_factor = 2
    in_dim, out_dim, heads = 32, 64, 8
    b, l = 2, 16                      # l = 4*4 spatial tokens

    key = jax.random.PRNGKey(0)
    ks = jax.random.split(key, 8)
    params = {
        "wq":    0.05 * jax.random.normal(ks[0], (out_dim, in_dim), jnp.float32),
        "bq":    0.05 * jax.random.normal(ks[1], (out_dim,), jnp.float32),
        "wkv":   0.05 * jax.random.normal(ks[2], (2 * out_dim, in_dim), jnp.float32),
        "wo":    0.05 * jax.random.normal(ks[3], (out_dim, out_dim), jnp.float32),
        "bo":    0.05 * jax.random.normal(ks[4], (out_dim,), jnp.float32),
        "gamma": 1.0 + 0.1 * jax.random.normal(ks[5], (in_dim,), jnp.float32),
        "beta":  0.1 * jax.random.normal(ks[6], (in_dim,), jnp.float32),
    }
    x = jax.random.normal(ks[7], (b, l, in_dim), jnp.float32)

    y = attention_resample(x, params, scale_factor=scale_factor, heads=heads)
    y = jax.block_until_ready(y)
    assert y.shape == (b, int(l * scale_factor * scale_factor), out_dim)
    assert bool(jnp.all(jnp.isfinite(y)))

    # correctness vs a plain-JAX f32 reference (loose tol: bf16 MXU + approx recip)
    y_ref = _reference(x, params, scale_factor=scale_factor, heads=heads)
    err = float(jnp.max(jnp.abs(y - y_ref)))
    assert err < 5e-2, f"mismatch vs reference: {err}"
    print("KERNEL_OK")
</pallas_src>

<mosaic_0001>
module attributes {stable_mosaic.version = 11 : i64} {
  func.func @_fused_kernel(%arg0: i32, %arg1: memref<2x16x32xf32, #tpu.memory_space<vmem>>, %arg2: memref<1x32xf32, #tpu.memory_space<vmem>>, %arg3: memref<1x32xf32, #tpu.memory_space<vmem>>, %arg4: memref<32x64xbf16, #tpu.memory_space<vmem>>, %arg5: memref<1x64xf32, #tpu.memory_space<vmem>>, %arg6: memref<32x64xbf16, #tpu.memory_space<vmem>>, %arg7: memref<32x64xbf16, #tpu.memory_space<vmem>>, %arg8: memref<128x32xbf16, #tpu.memory_space<vmem>>, %arg9: memref<128x64xbf16, #tpu.memory_space<vmem>>, %arg10: memref<128x8xbf16, #tpu.memory_space<vmem>>, %arg11: memref<8x64xbf16, #tpu.memory_space<vmem>>, %arg12: memref<64x64xbf16, #tpu.memory_space<vmem>>, %arg13: memref<1x64xf32, #tpu.memory_space<vmem>>, %arg14: memref<1x64x128xf32, #tpu.memory_space<vmem>>) attributes {dimension_semantics = [#tpu.dimension_semantics<parallel>], iteration_bounds = array<i64: 1>, scalar_prefetch = 0 : i64, scratch_operands = 0 : i64, tpu.core_type = #tpu.core_type<tc>, window_params = [{transform_indices = @transform_0, window_bounds = array<i64: 2, 16, 32>}, {pipeline_mode = #tpu.pipeline_mode<synchronous>, transform_indices = @transform_1, window_bounds = array<i64: 1, 32>}, {pipeline_mode = #tpu.pipeline_mode<synchronous>, transform_indices = @transform_2, window_bounds = array<i64: 1, 32>}, {pipeline_mode = #tpu.pipeline_mode<synchronous>, transform_indices = @transform_3, window_bounds = array<i64: 32, 64>}, {pipeline_mode = #tpu.pipeline_mode<synchronous>, transform_indices = @transform_4, window_bounds = array<i64: 1, 64>}, {pipeline_mode = #tpu.pipeline_mode<synchronous>, transform_indices = @transform_5, window_bounds = array<i64: 32, 64>}, {pipeline_mode = #tpu.pipeline_mode<synchronous>, transform_indices = @transform_6, window_bounds = array<i64: 32, 64>}, {pipeline_mode = #tpu.pipeline_mode<synchronous>, transform_indices = @transform_7, window_bounds = array<i64: 128, 32>}, {pipeline_mode = #tpu.pipeline_mode<synchronous>, transform_indices = @transform_8, window_bounds = array<i64: 128, 64>}, {pipeline_mode = #tpu.pipeline_mode<synchronous>, transform_indices = @transform_9, window_bounds = array<i64: 128, 8>}, {pipeline_mode = #tpu.pipeline_mode<synchronous>, transform_indices = @transform_10, window_bounds = array<i64: 8, 64>}, {pipeline_mode = #tpu.pipeline_mode<synchronous>, transform_indices = @transform_11, window_bounds = array<i64: 64, 64>}, {pipeline_mode = #tpu.pipeline_mode<synchronous>, transform_indices = @transform_12, window_bounds = array<i64: 1, 64>}, {transform_indices = @transform_13, window_bounds = array<i64: 1, 64, 128>}]} {
    %c0 = arith.constant 0 : index
    %c0_0 = arith.constant 0 : index
    %c0_1 = arith.constant 0 : index
    %0 = vector.load %arg1[%c0, %c0_0, %c0_1] : memref<2x16x32xf32, #tpu.memory_space<vmem>>, vector<1x16x32xf32>
    %1 = vector.shape_cast %0 : vector<1x16x32xf32> to vector<16x32xf32>
    %c1 = arith.constant 1 : index
    %c0_2 = arith.constant 0 : index
    %c0_3 = arith.constant 0 : index
    %2 = vector.load %arg1[%c1, %c0_2, %c0_3] : memref<2x16x32xf32, #tpu.memory_space<vmem>>, vector<1x16x32xf32>
    %3 = vector.shape_cast %2 : vector<1x16x32xf32> to vector<16x32xf32>
    %4 = tpu.concatenate %1, %3 in 0 : vector<16x32xf32>, vector<16x32xf32> -> vector<32x32xf32>
    %cst = arith.constant dense<0.000000e+00> : vector<32xf32>
    %5 = vector.multi_reduction <add>, %4, %cst [1] : vector<32x32xf32> to vector<32xf32>
    %6 = vector.shape_cast %5 : vector<32xf32> to vector<32x1xf32>
    %cst_4 = arith.constant 3.200000e+01 : f32
    %7 = vector.broadcast %cst_4 : f32 to vector<32x1xf32>
    %8 = arith.divf %6, %7 : vector<32x1xf32>
    %9 = vector.broadcast %8 : vector<32x1xf32> to vector<32x32xf32>
    %10 = arith.subf %4, %9 : vector<32x32xf32>
    %11 = arith.mulf %10, %10 : vector<32x32xf32>
    %cst_5 = arith.constant dense<0.000000e+00> : vector<32xf32>
    %12 = vector.multi_reduction <add>, %11, %cst_5 [1] : vector<32x32xf32> to vector<32xf32>
    %13 = vector.shape_cast %12 : vector<32xf32> to vector<32x1xf32>
    %cst_6 = arith.constant 3.200000e+01 : f32
    %14 = vector.broadcast %cst_6 : f32 to vector<32x1xf32>
    %15 = arith.divf %13, %14 : vector<32x1xf32>
    %16 = vector.broadcast %8 : vector<32x1xf32> to vector<32x32xf32>
    %17 = arith.subf %4, %16 : vector<32x32xf32>
    %cst_7 = arith.constant 9.99999974E-6 : f32
    %18 = vector.broadcast %cst_7 : f32 to vector<32x1xf32>
    %19 = arith.addf %15, %18 : vector<32x1xf32>
    %20 = math.rsqrt %19 : vector<32x1xf32>
    %21 = vector.broadcast %20 : vector<32x1xf32> to vector<32x32xf32>
    %22 = arith.mulf %17, %21 : vector<32x32xf32>
    %c0_8 = arith.constant 0 : index
    %c0_9 = arith.constant 0 : index
    %23 = vector.load %arg2[%c0_8, %c0_9] : memref<1x32xf32, #tpu.memory_space<vmem>>, vector<1x32xf32>
    %24 = vector.broadcast %23 : vector<1x32xf32> to vector<32x32xf32>
    %25 = arith.mulf %22, %24 : vector<32x32xf32>
    %c0_10 = arith.constant 0 : index
    %c0_11 = arith.constant 0 : index
    %26 = vector.load %arg3[%c0_10, %c0_11] : memref<1x32xf32, #tpu.memory_space<vmem>>, vector<1x32xf32>
    %27 = vector.broadcast %26 : vector<1x32xf32> to vector<32x32xf32>
    %28 = arith.addf %25, %27 : vector<32x32xf32>
    %29 = arith.truncf %28 : vector<32x32xf32> to vector<32x32xbf16>
    %c0_12 = arith.constant 0 : index
    %c0_13 = arith.constant 0 : index
    %30 = vector.load %arg4[%c0_12, %c0_13] : memref<32x64xbf16, #tpu.memory_space<vmem>>, vector<32x64xbf16>
    %cst_14 = arith.constant dense<0.000000e+00> : vector<32x64xf32>
    %31 = tpu.matmul %29, %30, %cst_14 {dimension_numbers = #tpu.dot_dimension_numbers<[1], [0], [0], [1], [0, 0, 1, 1], [], []>} : vector<32x32xbf16>, vector<32x64xbf16>, vector<32x64xf32> -> vector<32x64xf32>
    %c0_15 = arith.constant 0 : index
    %c0_16 = arith.constant 0 : index
    %32 = vector.load %arg5[%c0_15, %c0_16] : memref<1x64xf32, #tpu.memory_space<vmem>>, vector<1x64xf32>
    %33 = vector.broadcast %32 : vector<1x64xf32> to vector<32x64xf32>
    %34 = arith.addf %31, %33 : vector<32x64xf32>
    %c0_17 = arith.constant 0 : index
    %c0_18 = arith.constant 0 : index
    %35 = vector.load %arg6[%c0_17, %c0_18] : memref<32x64xbf16, #tpu.memory_space<vmem>>, vector<32x64xbf16>
    %cst_19 = arith.constant dense<0.000000e+00> : vector<32x64xf32>
    %36 = tpu.matmul %29, %35, %cst_19 {dimension_numbers = #tpu.dot_dimension_numbers<[1], [0], [0], [1], [0, 0, 1, 1], [], []>} : vector<32x32xbf16>, vector<32x64xbf16>, vector<32x64xf32> -> vector<32x64xf32>
    %c0_20 = arith.constant 0 : index
    %c0_21 = arith.constant 0 : index
    %37 = vector.load %arg7[%c0_20, %c0_21] : memref<32x64xbf16, #tpu.memory_space<vmem>>, vector<32x64xbf16>
    %cst_22 = arith.constant dense<0.000000e+00> : vector<32x64xf32>
    %38 = tpu.matmul %29, %37, %cst_22 {dimension_numbers = #tpu.dot_dimension_numbers<[1], [0], [0], [1], [0, 0, 1, 1], [], []>} : vector<32x32xbf16>, vector<32x64xbf16>, vector<32x64xf32> -> vector<32x64xf32>
    %c0_23 = arith.constant 0 : index
    %c0_24 = arith.constant 0 : index
    %39 = vector.load %arg8[%c0_23, %c0_24] : memref<128x32xbf16, #tpu.memory_space<vmem>>, vector<128x32xbf16>
    %40 = arith.truncf %34 : vector<32x64xf32> to vector<32x64xbf16>
    %cst_25 = arith.constant dense<0.000000e+00> : vector<128x64xf32>
    %41 = tpu.matmul %39, %40, %cst_25 {dimension_numbers = #tpu.dot_dimension_numbers<[1], [0], [0], [1], [0, 0, 1, 1], [], []>} : vector<128x32xbf16>, vector<32x64xbf16>, vector<128x64xf32> -> vector<128x64xf32>
    %c0_26 = arith.constant 0 : index
    %c0_27 = arith.constant 0 : index
    %42 = vector.load %arg9[%c0_26, %c0_27] : memref<128x64xbf16, #tpu.memory_space<vmem>>, vector<128x64xbf16>
    %43 = vector.extract_strided_slice %36 {offsets = [0, 0], sizes = [16, 64], strides = [1, 1]} : vector<32x64xf32> to vector<16x64xf32>
    %44 = arith.truncf %43 : vector<16x64xf32> to vector<16x64xbf16>
    %45 = vector.extract_strided_slice %38 {offsets = [0, 0], sizes = [16, 64], strides = [1, 1]} : vector<32x64xf32> to vector<16x64xf32>
    %46 = arith.truncf %45 : vector<16x64xf32> to vector<16x64xbf16>
    %47 = vector.extract_strided_slice %41 {offsets = [0, 0], sizes = [64, 64], strides = [1, 1]} : vector<128x64xf32> to vector<64x64xf32>
    %48 = arith.truncf %47 : vector<64x64xf32> to vector<64x64xbf16>
    %49 = tpu.concatenate %44, %44, %44, %44, %44, %44, %44, %44 in 0 : vector<16x64xbf16>, vector<16x64xbf16>, vector<16x64xbf16>, vector<16x64xbf16>, vector<16x64xbf16>, vector<16x64xbf16>, vector<16x64xbf16>, vector<16x64xbf16> -> vector<128x64xbf16>
    %50 = tpu.concatenate %46, %46, %46, %46, %46, %46, %46, %46 in 0 : vector<16x64xbf16>, vector<16x64xbf16>, vector<16x64xbf16>, vector<16x64xbf16>, vector<16x64xbf16>, vector<16x64xbf16>, vector<16x64xbf16>, vector<16x64xbf16> -> vector<128x64xbf16>
    %51 = arith.mulf %49, %42 : vector<128x64xbf16>
    %52 = arith.mulf %50, %42 : vector<128x64xbf16>
    "tpu.trace_start"() <{level = 10 : i32, message = "qe,ce->qc"}> : () -> ()
    %cst_28 = arith.constant dense<0.000000e+00> : vector<64x128xf32>
    %53 = tpu.matmul %48, %51, %cst_28 {dimension_numbers = #tpu.dot_dimension_numbers<[1], [1], [0], [0], [0, 0, 1, 0], [], []>} : vector<64x64xbf16>, vector<128x64xbf16>, vector<64x128xf32> -> vector<64x128xf32>
    "tpu.trace_stop"() : () -> ()
    %cst_29 = arith.constant dense<0xFF800000> : vector<64xf32>
    %54 = vector.multi_reduction <maximumf>, %53, %cst_29 [1] : vector<64x128xf32> to vector<64xf32>
    %55 = vector.shape_cast %54 : vector<64xf32> to vector<64x1xf32>
    %56 = vector.broadcast %55 : vector<64x1xf32> to vector<64x128xf32>
    %57 = arith.subf %53, %56 : vector<64x128xf32>
    %58 = math.exp %57 : vector<64x128xf32>
    %59 = arith.truncf %58 : vector<64x128xf32> to vector<64x128xbf16>
    %c0_30 = arith.constant 0 : index
    %c0_31 = arith.constant 0 : index
    %60 = vector.load %arg10[%c0_30, %c0_31] : memref<128x8xbf16, #tpu.memory_space<vmem>>, vector<128x8xbf16>
    %cst_32 = arith.constant dense<0.000000e+00> : vector<64x8xf32>
    %61 = tpu.matmul %59, %60, %cst_32 {dimension_numbers = #tpu.dot_dimension_numbers<[1], [0], [0], [1], [0, 0, 1, 1], [], []>} : vector<64x128xbf16>, vector<128x8xbf16>, vector<64x8xf32> -> vector<64x8xf32>
    %cst_33 = arith.constant 9.99999968E-21 : f32
    %62 = vector.broadcast %cst_33 : f32 to vector<64x8xf32>
    %63 = arith.maximumf %61, %62 : vector<64x8xf32>
    %64 = tpu.reciprocal %63 {approx = true} : vector<64x8xf32> -> vector<64x8xf32>
    %cst_34 = arith.constant dense<0.000000e+00> : vector<64x64xf32>
    %65 = tpu.matmul %59, %52, %cst_34 {dimension_numbers = #tpu.dot_dimension_numbers<[1], [0], [0], [1], [0, 0, 1, 1], [], []>} : vector<64x128xbf16>, vector<128x64xbf16>, vector<64x64xf32> -> vector<64x64xf32>
    %66 = arith.truncf %64 : vector<64x8xf32> to vector<64x8xbf16>
    %c0_35 = arith.constant 0 : index
    %c0_36 = arith.constant 0 : index
    %67 = vector.load %arg11[%c0_35, %c0_36] : memref<8x64xbf16, #tpu.memory_space<vmem>>, vector<8x64xbf16>
    %cst_37 = arith.constant dense<0.000000e+00> : vector<64x64xf32>
    %68 = tpu.matmul %66, %67, %cst_37 {dimension_numbers = #tpu.dot_dimension_numbers<[1], [0], [0], [1], [0, 0, 1, 1], [], []>} : vector<64x8xbf16>, vector<8x64xbf16>, vector<64x64xf32> -> vector<64x64xf32>
    %69 = arith.mulf %65, %68 : vector<64x64xf32>
    %70 = arith.truncf %69 : vector<64x64xf32> to vector<64x64xbf16>
    %71 = vector.extract_strided_slice %36 {offsets = [16, 0], sizes = [16, 64], strides = [1, 1]} : vector<32x64xf32> to vector<16x64xf32>
    %72 = arith.truncf %71 : vector<16x64xf32> to vector<16x64xbf16>
    %73 = vector.extract_strided_slice %38 {offsets = [16, 0], sizes = [16, 64], strides = [1, 1]} : vector<32x64xf32> to vector<16x64xf32>
    %74 = arith.truncf %73 : vector<16x64xf32> to vector<16x64xbf16>
    %75 = vector.extract_strided_slice %41 {offsets = [64, 0], sizes = [64, 64], strides = [1, 1]} : vector<128x64xf32> to vector<64x64xf32>
    %76 = arith.truncf %75 : vector<64x64xf32> to vector<64x64xbf16>
    %77 = tpu.concatenate %72, %72, %72, %72, %72, %72, %72, %72 in 0 : vector<16x64xbf16>, vector<16x64xbf16>, vector<16x64xbf16>, vector<16x64xbf16>, vector<16x64xbf16>, vector<16x64xbf16>, vector<16x64xbf16>, vector<16x64xbf16> -> vector<128x64xbf16>
    %78 = tpu.concatenate %74, %74, %74, %74, %74, %74, %74, %74 in 0 : vector<16x64xbf16>, vector<16x64xbf16>, vector<16x64xbf16>, vector<16x64xbf16>, vector<16x64xbf16>, vector<16x64xbf16>, vector<16x64xbf16>, vector<16x64xbf16> -> vector<128x64xbf16>
    %79 = arith.mulf %77, %42 : vector<128x64xbf16>
    %80 = arith.mulf %78, %42 : vector<128x64xbf16>
    "tpu.trace_start"() <{level = 10 : i32, message = "qe,ce->qc"}> : () -> ()
    %cst_38 = arith.constant dense<0.000000e+00> : vector<64x128xf32>
    %81 = tpu.matmul %76, %79, %cst_38 {dimension_numbers = #tpu.dot_dimension_numbers<[1], [1], [0], [0], [0, 0, 1, 0], [], []>} : vector<64x64xbf16>, vector<128x64xbf16>, vector<64x128xf32> -> vector<64x128xf32>
    "tpu.trace_stop"() : () -> ()
    %cst_39 = arith.constant dense<0xFF800000> : vector<64xf32>
    %82 = vector.multi_reduction <maximumf>, %81, %cst_39 [1] : vector<64x128xf32> to vector<64xf32>
    %83 = vector.shape_cast %82 : vector<64xf32> to vector<64x1xf32>
    %84 = vector.broadcast %83 : vector<64x1xf32> to vector<64x128xf32>
    %85 = arith.subf %81, %84 : vector<64x128xf32>
    %86 = math.exp %85 : vector<64x128xf32>
    %87 = arith.truncf %86 : vector<64x128xf32> to vector<64x128xbf16>
    %c0_40 = arith.constant 0 : index
    %c0_41 = arith.constant 0 : index
    %88 = vector.load %arg10[%c0_40, %c0_41] : memref<128x8xbf16, #tpu.memory_space<vmem>>, vector<128x8xbf16>
    %cst_42 = arith.constant dense<0.000000e+00> : vector<64x8xf32>
    %89 = tpu.matmul %87, %88, %cst_42 {dimension_numbers = #tpu.dot_dimension_numbers<[1], [0], [0], [1], [0, 0, 1, 1], [], []>} : vector<64x128xbf16>, vector<128x8xbf16>, vector<64x8xf32> -> vector<64x8xf32>
    %cst_43 = arith.constant 9.99999968E-21 : f32
    %90 = vector.broadcast %cst_43 : f32 to vector<64x8xf32>
    %91 = arith.maximumf %89, %90 : vector<64x8xf32>
    %92 = tpu.reciprocal %91 {approx = true} : vector<64x8xf32> -> vector<64x8xf32>
    %cst_44 = arith.constant dense<0.000000e+00> : vector<64x64xf32>
    %93 = tpu.matmul %87, %80, %cst_44 {dimension_numbers = #tpu.dot_dimension_numbers<[1], [0], [0], [1], [0, 0, 1, 1], [], []>} : vector<64x128xbf16>, vector<128x64xbf16>, vector<64x64xf32> -> vector<64x64xf32>
    %94 = arith.truncf %92 : vector<64x8xf32> to vector<64x8xbf16>
    %c0_45 = arith.constant 0 : index
    %c0_46 = arith.constant 0 : index
    %95 = vector.load %arg11[%c0_45, %c0_46] : memref<8x64xbf16, #tpu.memory_space<vmem>>, vector<8x64xbf16>
    %cst_47 = arith.constant dense<0.000000e+00> : vector<64x64xf32>
    %96 = tpu.matmul %94, %95, %cst_47 {dimension_numbers = #tpu.dot_dimension_numbers<[1], [0], [0], [1], [0, 0, 1, 1], [], []>} : vector<64x8xbf16>, vector<8x64xbf16>, vector<64x64xf32> -> vector<64x64xf32>
    %97 = arith.mulf %93, %96 : vector<64x64xf32>
    %98 = arith.truncf %97 : vector<64x64xf32> to vector<64x64xbf16>
    %99 = tpu.concatenate %70, %98 in 0 : vector<64x64xbf16>, vector<64x64xbf16> -> vector<128x64xbf16>
    %c0_48 = arith.constant 0 : index
    %c0_49 = arith.constant 0 : index
    %100 = vector.load %arg12[%c0_48, %c0_49] : memref<64x64xbf16, #tpu.memory_space<vmem>>, vector<64x64xbf16>
    %cst_50 = arith.constant dense<0.000000e+00> : vector<128x64xf32>
    %101 = tpu.matmul %99, %100, %cst_50 {dimension_numbers = #tpu.dot_dimension_numbers<[1], [0], [0], [1], [0, 0, 1, 1], [], []>} : vector<128x64xbf16>, vector<64x64xbf16>, vector<128x64xf32> -> vector<128x64xf32>
    %c0_51 = arith.constant 0 : index
    %c0_52 = arith.constant 0 : index
    %102 = vector.load %arg13[%c0_51, %c0_52] : memref<1x64xf32, #tpu.memory_space<vmem>>, vector<1x64xf32>
    %103 = vector.broadcast %102 : vector<1x64xf32> to vector<128x64xf32>
    %104 = arith.addf %101, %103 : vector<128x64xf32>
    %105 = vector.extract_strided_slice %104 {offsets = [0, 0], sizes = [64, 64], strides = [1, 1]} : vector<128x64xf32> to vector<64x64xf32>
    %106 = vector.extract_strided_slice %104 {offsets = [64, 0], sizes = [64, 64], strides = [1, 1]} : vector<128x64xf32> to vector<64x64xf32>
    %107 = tpu.concatenate %105, %106 in 1 : vector<64x64xf32>, vector<64x64xf32> -> vector<64x128xf32>
    %c0_53 = arith.constant 0 : index
    %c0_54 = arith.constant 0 : index
    %c0_55 = arith.constant 0 : index
    %108 = vector.load %arg14[%c0_53, %c0_54, %c0_55] : memref<1x64x128xf32, #tpu.memory_space<vmem>>, vector<1x64x128xf32>
    %109 = vector.shape_cast %108 : vector<1x64x128xf32> to vector<64x128xf32>
    %110 = vector.shape_cast %107 : vector<64x128xf32> to vector<1x64x128xf32>
    tpu.vector_store %arg14[%c0_53, %c0_54, %c0_55], %110 {strides = array<i32>} : memref<1x64x128xf32, #tpu.memory_space<vmem>>, vector<1x64x128xf32>,
    return
  }
  func.func @transform_0(%arg0: i32) -> (i32, i32, i32) {
    %c0_i32 = arith.constant 0 : i32
    %c0_i32_0 = arith.constant 0 : i32
    %c0_i32_1 = arith.constant 0 : i32
    return %arg0, %c0_i32, %c0_i32_0 : i32, i32, i32
  }
  func.func @transform_1(%arg0: i32) -> (i32, i32) {
    %c0_i32 = arith.constant 0 : i32
    %c0_i32_0 = arith.constant 0 : i32
    %c0_i32_1 = arith.constant 0 : i32
    return %c0_i32, %c0_i32_0 : i32, i32
  }
  func.func @transform_2(%arg0: i32) -> (i32, i32) {
    %c0_i32 = arith.constant 0 : i32
    %c0_i32_0 = arith.constant 0 : i32
    %c0_i32_1 = arith.constant 0 : i32
    return %c0_i32, %c0_i32_0 : i32, i32
  }
  func.func @transform_3(%arg0: i32) -> (i32, i32) {
    %c0_i32 = arith.constant 0 : i32
    %c0_i32_0 = arith.constant 0 : i32
    %c0_i32_1 = arith.constant 0 : i32
    return %c0_i32, %c0_i32_0 : i32, i32
  }
  func.func @transform_4(%arg0: i32) -> (i32, i32) {
    %c0_i32 = arith.constant 0 : i32
    %c0_i32_0 = arith.constant 0 : i32
    %c0_i32_1 = arith.constant 0 : i32
    return %c0_i32, %c0_i32_0 : i32, i32
  }
  func.func @transform_5(%arg0: i32) -> (i32, i32) {
    %c0_i32 = arith.constant 0 : i32
    %c0_i32_0 = arith.constant 0 : i32
    %c0_i32_1 = arith.constant 0 : i32
    return %c0_i32, %c0_i32_0 : i32, i32
  }
  func.func @transform_6(%arg0: i32) -> (i32, i32) {
    %c0_i32 = arith.constant 0 : i32
    %c0_i32_0 = arith.constant 0 : i32
    %c0_i32_1 = arith.constant 0 : i32
    return %c0_i32, %c0_i32_0 : i32, i32
  }
  func.func @transform_7(%arg0: i32) -> (i32, i32) {
    %c0_i32 = arith.constant 0 : i32
    %c0_i32_0 = arith.constant 0 : i32
    %c0_i32_1 = arith.constant 0 : i32
    return %c0_i32, %c0_i32_0 : i32, i32
  }
  func.func @transform_8(%arg0: i32) -> (i32, i32) {
    %c0_i32 = arith.constant 0 : i32
    %c0_i32_0 = arith.constant 0 : i32
    %c0_i32_1 = arith.constant 0 : i32
    return %c0_i32, %c0_i32_0 : i32, i32
  }
  func.func @transform_9(%arg0: i32) -> (i32, i32) {
    %c0_i32 = arith.constant 0 : i32
    %c0_i32_0 = arith.constant 0 : i32
    %c0_i32_1 = arith.constant 0 : i32
    return %c0_i32, %c0_i32_0 : i32, i32
  }
  func.func @transform_10(%arg0: i32) -> (i32, i32) {
    %c0_i32 = arith.constant 0 : i32
    %c0_i32_0 = arith.constant 0 : i32
    %c0_i32_1 = arith.constant 0 : i32
    return %c0_i32, %c0_i32_0 : i32, i32
  }
  func.func @transform_11(%arg0: i32) -> (i32, i32) {
    %c0_i32 = arith.constant 0 : i32
    %c0_i32_0 = arith.constant 0 : i32
    %c0_i32_1 = arith.constant 0 : i32
    return %c0_i32, %c0_i32_0 : i32, i32
  }
  func.func @transform_12(%arg0: i32) -> (i32, i32) {
    %c0_i32 = arith.constant 0 : i32
    %c0_i32_0 = arith.constant 0 : i32
    %c0_i32_1 = arith.constant 0 : i32
    return %c0_i32, %c0_i32_0 : i32, i32
  }
  func.func @transform_13(%arg0: i32) -> (i32, i32, i32) {
    %c0_i32 = arith.constant 0 : i32
    %c0_i32_0 = arith.constant 0 : i32
    %c0_i32_1 = arith.constant 0 : i32
    return %arg0, %c0_i32, %c0_i32_0 : i32, i32, i32
  }
}

</mosaic_0001>

<bundles_post_ra>
// kernel: tpu_custom_call.1
= control target key start
LH: loop header
LB: loop body
LE: loop exit
PB: predicated region body
PF: predicated region fallthrough
CT: control target
= control target key end

     0   :  { %vm51_vm0 = vcmask 261120   ;;  %s2491_s0 = inlined_call_operand.vmem [shape: f32[2,16,32], index: 0, kind: input, shape index: {}]   ;;  %s2492_s1 = inlined_call_operand.vmem [shape: f32[1,32], index: 1, kind: input, shape index: {}]   ;;  %s2493_s2 = inlined_call_operand.vmem [shape: f32[1,32], index: 2, kind: input, shape index: {}]   ;;  %s2494_s3 = inlined_call_operand.vmem [shape: bf16[32,64], index: 3, kind: input, shape index: {}]   ;;  %s2495_s4 = inlined_call_operand.vmem [shape: f32[1,64], index: 4, kind: input, shape index: {}]   ;;  %s2496_s5 = inlined_call_operand.vmem [shape: bf16[32,64], index: 5, kind: input, shape index: {}]   ;;  %s2497_s6 = inlined_call_operand.vmem [shape: bf16[32,64], index: 6, kind: input, shape index: {}]   ;;  %s2498_s7 = inlined_call_operand.vmem [shape: bf16[128,32], index: 7, kind: input, shape index: {}]   ;;  %s2499_s8 = inlined_call_operand.vmem [shape: bf16[128,64], index: 8, kind: input, shape index: {}]   ;;  %s2500_s9 = inlined_call_operand.vmem [shape: bf16[128,8], index: 9, kind: input, shape index: {}]   ;;  %s2501_s10 = inlined_call_operand.vmem [shape: bf16[8,64], index: 10, kind: input, shape index: {}]   ;;  %s2502_s11 = inlined_call_operand.vmem [shape: bf16[64,64], index: 11, kind: input, shape index: {}]   ;;  %s2503_s12 = inlined_call_operand.vmem [shape: f32[1,64], index: 12, kind: input, shape index: {}]   ;;  %s2504_s13 = inlined_call_operand.hbm [shape: f32[1,64,128], index: 13, kind: output, shape index: {}]  }
   0x1   :  { %v1429_v0 = vld [vmem:[%s2491_s0 + $0x10] sm:$0xff]  ;;  %v46_v1 = vld [vmem:[%s2491_s0] sm:$0xff] }
   0x2   :  { %v58_v2 = vsel %vm51_vm0, %v1429_v0, 0.0  ;;  %v52_v3 = vsel %vm51_vm0, %v46_v1, 0.0 }
   0x3   :  { %59 = vadd.xlane.f32.xlu1 %v58_v2  ;;  %53 = vadd.xlane.f32.xlu0 %v52_v3 }
   0x4   :  { %18 = vsyncpa [#allocation3], 0  ;;  %v1430_v4 = vld [vmem:[%s2491_s0 + $0x18] sm:$0xff]  ;;  %v47_v5 = vld [vmem:[%s2491_s0 + $0x8] sm:$0xff]  ;;  %v1803_v8 = vmov 32.0   ;;  %vm515_vm14 = vcmask 523264  }
   0x5   :  { %v61_v6 = vsel %vm51_vm0, %v1430_v4, 0.0  ;;  %v55_v7 = vsel %vm51_vm0, %v47_v5, 0.0  ;;  %1703 = vrcp.f32 %v1803_v8  ;;  %v1606_v35 = vld [vmem:[%s2494_s3 + $0x8] sm:$0xff]  ;;  %v1605_v41 = vld [vmem:[%s2494_s3] sm:$0xff]  ;;  %vm781_vm15 = vcmask 1043456   ;;  %s1417_s30 = sshll.u32 %s2504_s13, 4  ;;  %s1418_s30 = int_to_ptr.hbm [resolvable:$true] %s1417_s30 }
   0x6   :  { %v1608_v36 = vld [vmem:[%s2496_s5 + $0x8] sm:$0xff]  ;;  %197 = vmatpush.bf16.msra.mxu0 %v1606_v35  ;;  %v1607_v42 = vld [vmem:[%s2496_s5] sm:$0xff]  ;;  %s1806_s14 = smov 128   ;;  %s1807_s15 = smov 8  }
   0x7   :  { %v1610_v37 = vld [vmem:[%s2497_s6 + $0x8] sm:$0xff]  ;;  %232 = vmatpush.bf16.msra.mxu1 %v1608_v36  ;;  %v1609_v43 = vld [vmem:[%s2497_s6] sm:$0xff] }
   0x8   :  { %267 = vmatpush.bf16.msra.mxu2 %v1610_v37 }
   0xa   :  { %198 = vmatpush.bf16.msra.mxu0 %v1605_v41 }
   0xb   :  { %62 = vadd.xlane.f32.xlu1 %v61_v6  ;;  %56 = vadd.xlane.f32.xlu0 %v55_v7  ;;  %v1704_v9 = vpop.eup %1703 }
   0xc   :  { %v65_v10 = vmul.f32 32.0, %v1704_v9  ;;  %vm69_vm1 = vweird.f32 %v1704_v9  ;;  %233 = vmatpush.bf16.msra.mxu1 %v1607_v42  ;;  %268 = vmatpush.bf16.msra.mxu2 %v1609_v43 }
   0xe   :  { %v66_v11 = vsub.f32 1.0, %v65_v10 }
  0x10   :  { %v67_v12 = vmul.f32 %v1704_v9, %v66_v11 }
  0x12   :  { %v68_v13 = vadd.f32 %v1704_v9, %v67_v12 }
  0x14   :  { %v70_v14 = vsel %vm69_vm1, %v1704_v9, %v68_v13  ;;  %v1699_v9 = vld [vmem:[%s2492_s1] ss:$0 sm:$0xff]  ;;  %s1804_s1 = smov 64  }
  0x76   :  { %v60_v15 = vpop.xlane.xlu1 %59  ;;  %v54_v16 = vpop.xlane.xlu0 %53 }
  0x77   :  { %v73_v17 = vmul.f32 %v70_v14, %v60_v15  ;;  %v71_v18 = vmul.f32 %v70_v14, %v54_v16  ;;  %v1700_v16 = vld [vmem:[%s2493_s2] ss:$0 sm:$0xff] }
  0x79   :  { %v1894_v19 = vsub.f32 %v1429_v0, %v73_v17  ;;  %v1896_v20 = vsub.f32 %v46_v1, %v71_v18 }
  0x7b   :  { %v81_v21 = vmul.f32 %v1894_v19, %v1894_v19  ;;  %v79_v22 = vmul.f32 %v1896_v20, %v1896_v20 }
  0x7d   :  { %v89_v23 = vsel %vm51_vm0, %v81_v21, 0.0  ;;  %v83_v24 = vsel %vm51_vm0, %v79_v22, 0.0 }
  0x7e   :  { %v63_v25 = vpop.xlane.xlu1 %62  ;;  %90 = vadd.xlane.f32.xlu0 %v89_v23  ;;  %84 = vadd.xlane.f32.xlu2 %v83_v24  ;;  %v57_v26 = vpop.xlane.xlu0 %56 }
  0x7f   :  { %v74_v27 = vmul.f32 %v70_v14, %v63_v25  ;;  %v72_v28 = vmul.f32 %v70_v14, %v57_v26 }
  0x81   :  { %v1904_v29 = vsub.f32 %v1430_v4, %v74_v27  ;;  %v1906_v30 = vsub.f32 %v47_v5, %v72_v28 }
  0x83   :  { %v82_v31 = vmul.f32 %v1904_v29, %v1904_v29  ;;  %v80_v32 = vmul.f32 %v1906_v30, %v1906_v30 }
  0x85   :  { %v92_v33 = vsel %vm51_vm0, %v82_v31, 0.0  ;;  %v86_v34 = vsel %vm51_vm0, %v80_v32, 0.0 }
  0x86   :  { %93 = vadd.xlane.f32.xlu1 %v92_v33  ;;  %87 = vadd.xlane.f32.xlu2 %v86_v34 }
  0xf1   :  { %v85_v38 = vpop.xlane.xlu2 %84  ;;  %v91_v40 = vpop.xlane.xlu0 %90 }
  0xf2   :  { %v95_v39 = vmul.f32 %v85_v38, %v70_v14  ;;  %v97_v45 = vmul.f32 %v91_v40, %v70_v14 }
  0xf4   :  { %v99_v44 = vadd.f32 1e-05, %v95_v39  ;;  %v101_v46 = vadd.f32 1e-05, %v97_v45 }
  0xf6   :  { %1705 = vrsqrt.f32 %v99_v44  ;;  %vm109_vm3 = vweird.f32 %v99_v44  ;;  %vm129_vm10 = vweird.f32 %v101_v46 }
  0xf7   :  { %1707 = vrsqrt.f32 %v101_v46 }
  0xf9   :  { %v94_v47 = vpop.xlane.xlu1 %93  ;;  %v88_v48 = vpop.xlane.xlu2 %87 }
  0xfa   :  { %v98_v49 = vmul.f32 %v94_v47, %v70_v14  ;;  %v96_v50 = vmul.f32 %v88_v48, %v70_v14  ;;  %v1676_v47 = vld [vmem:[%s2499_s8 + $0x30] sm:$0xff]  }
  0xfc   :  { %v1706_v51 = vpop.eup %1705  ;;  %v102_v52 = vadd.f32 1e-05, %v98_v49  ;;  %v100_v53 = vadd.f32 1e-05, %v96_v50 }
  0xfd   :  { %v104_v54 = vmul.f32 %v1706_v51, %v99_v44  ;;  %v1708_v57 = vpop.eup %1707  ;;  %vm110_vm2 = vweird.f32 %v1706_v51 }
  0xfe   :  { %1709 = vrsqrt.f32 %v102_v52  ;;  %v124_v63 = vmul.f32 %v1708_v57, %v101_v46  ;;  %vm111_vm4 = vmor %vm109_vm3, %vm110_vm2  ;;  %vm119_vm6 = vweird.f32 %v100_v53  ;;  %vm139_vm8 = vweird.f32 %v102_v52 }
  0xff   :  { %v105_v55 = vmul.f32 %v1706_v51, %v104_v54  ;;  %1711 = vrsqrt.f32 %v100_v53  ;;  %vm130_vm11 = vweird.f32 %v1708_v57 }
 0x100   :  { %v125_v4 = vmul.f32 %v1708_v57, %v124_v63  ;;  %vm131_vm13 = vmor %vm129_vm10, %vm130_vm11 }
 0x101   :  { %v106_v56 = vmul.f32 0.5, %v105_v55 }
 0x102   :  { %v126_v10 = vmul.f32 0.5, %v125_v4  ;;  %v1701_v4 = vld [vmem:[%s2495_s4] ss:$0 sm:$0xff] }
 0x103   :  { %v107_v58 = vsub.f32 1.5, %v106_v56  ;;  %v1966_v56 = vunpack.c.l.bf16 %v1676_v47 }
 0x104   :  { %v1710_v59 = vpop.eup %1709  ;;  %v127_v17 = vsub.f32 1.5, %v126_v10 }
 0x105   :  { %v1712_v60 = vpop.eup %1711  ;;  %v134_v61 = vmul.f32 %v1710_v59, %v102_v52  ;;  %v108_v62 = vmul.f32 %v1706_v51, %v107_v58  ;;  %vm140_vm9 = vweird.f32 %v1710_v59 }
 0x106   :  { %v114_v0 = vmul.f32 %v1712_v60, %v100_v53  ;;  %vm120_vm5 = vweird.f32 %v1712_v60  ;;  %vm141_vm12 = vmor %vm139_vm8, %vm140_vm9  ;;  %v128_v23 = vmul.f32 %v1708_v57, %v127_v17  ;;  %v1674_v17 = vld [vmem:[%s2499_s8 + $0x20] sm:$0xff]  }
 0x107   :  { %v135_v1 = vmul.f32 %v1710_v59, %v134_v61  ;;  %v112_v3 = vsel %vm111_vm4, %v1706_v51, %v108_v62  ;;  %vm121_vm7 = vmor %vm119_vm6, %vm120_vm5 }
 0x108   :  { %v115_v2 = vmul.f32 %v1712_v60, %v114_v0  ;;  %v143_v8 = vmul.f32 %v112_v3, %v1896_v20  ;;  %v132_v26 = vsel %vm131_vm13, %v1708_v57, %v128_v23  ;;  %v1968_v57 = vunpack.c.h.bf16 %v1676_v47 }
 0x109   :  { %v136_v6 = vmul.f32 0.5, %v135_v1  ;;  %v145_v28 = vmul.f32 %v132_v26, %v1894_v19  ;;  %v1677_v19 = vld [vmem:[%s2499_s8 + $0x38] sm:$0xff]   ;;  %v1675_v1 = vld [vmem:[%s2499_s8 + $0x28] sm:$0xff]  }
 0x10a   :  { %v116_v5 = vmul.f32 0.5, %v115_v2  ;;  %v151_v15 = vmul.f32 %v1699_v9, %v143_v8  ;;  %v1951_v44 = vunpack.c.l.bf16 %v1677_v19  ;;  %v1953_v45 = vunpack.c.h.bf16 %v1677_v19 }
 0x10b   :  { %v137_v12 = vsub.f32 1.5, %v136_v6  ;;  %v153_v31 = vmul.f32 %v1699_v9, %v145_v28  ;;  %v2002_v28 = vunpack.c.l.bf16 %v1674_v17 }
 0x10c   :  { %v117_v7 = vsub.f32 1.5, %v116_v5  ;;  %v159_v21 = vadd.f32 %v1700_v16, %v151_v15 }
 0x10d   :  { %v138_v20 = vmul.f32 %v1710_v59, %v137_v12  ;;  %v161_v33 = vadd.f32 %v1700_v16, %v153_v31  ;;  %v1991_v12 = vunpack.c.h.bf16 %v1675_v1  ;;  %v1673_v31 = vld [vmem:[%s2499_s8 + $0x18] sm:$0xff]  }
 0x10e   :  { %v118_v11 = vmul.f32 %v1712_v60, %v117_v7 }
 0x10f   :  { %v142_v25 = vsel %vm141_vm12, %v1710_v59, %v138_v20 }
 0x110   :  { %v122_v13 = vsel %vm121_vm7, %v1712_v60, %v118_v11  ;;  %v146_v27 = vmul.f32 %v142_v25, %v1904_v29  ;;  %v1989_v11 = vunpack.c.l.bf16 %v1675_v1 }
 0x111   :  { %v144_v14 = vmul.f32 %v122_v13, %v1906_v30 }
 0x112   :  { %v154_v30 = vmul.f32 %v1699_v9, %v146_v27 }
 0x113   :  { %v152_v18 = vmul.f32 %v1699_v9, %v144_v14 }
 0x114   :  { %v162_v32 = vadd.f32 %v1700_v16, %v154_v30  ;;  %v2004_v30 = vunpack.c.h.bf16 %v1674_v17 }
 0x115   :  { %v160_v22 = vadd.f32 %v1700_v16, %v152_v18 }
 0x116   :  { %v164_v34 = vpack.c.bf16 %v162_v32, %v161_v33 }
 0x117   :  { %v163_v24 = vpack.c.bf16 %v160_v22, %v159_v21 }
 0x119   :  { %1439 = vmatmul.msk.bf16.vlgmr.msra.gmra.mxu0 %vm51_vm0, %v163_v24  ;;  %1449 = vmatmul.msk.bf16.vlgmr.msra.gmra.mxu1 %vm51_vm0, %v163_v24 }
 0x11a   :  { %1459 = vmatmul.msk.bf16.vlgmr.msra.gmra.mxu2 %vm51_vm0, %v163_v24 }
 0x129   :  { %1440 = vmatmul.msk.bf16.gmra.mxu0 %vm51_vm0, %v164_v34  ;;  %1450 = vmatmul.msk.bf16.gmra.mxu1 %vm51_vm0, %v164_v34 }
 0x12a   :  { %1460 = vmatmul.msk.bf16.gmra.mxu2 %vm51_vm0, %v164_v34 }
 0x196   :  { %v200_v35 = vpop.f32.mrf.mxu0  ;;  %v235_v36 = vpop.f32.mrf.mxu1 }
 0x197   :  { %v427_v37 = vpack.c.bf16 %v235_v36, %v235_v36  ;;  %v201_v26 = vadd.f32 %v1701_v4, %v200_v35 }
 0x199   :  { %v437_v41 = vunpack.c.l.b16 %v427_v37 }
 0x19d   :  { %v270_v38 = vpop.f32.mrf.mxu2 }
 0x19e   :  { %v202_v39 = vpop.f32.mrf.mxu0  ;;  %v237_v40 = vpop.f32.mrf.mxu1  ;;  %v429_v46 = vpack.c.bf16 %v270_v38, %v270_v38 }
 0x19f   :  { %v428_v29 = vpack.c.bf16 %v237_v40, %v237_v40  ;;  %v203_v22 = vadd.f32 %v1701_v4, %v202_v39 }
 0x1a0   :  { %v443_v58 = vunpack.c.l.b16 %v429_v46  ;;  %v2025_v46 = vunpack.c.h.bf16 %v1673_v31 }
 0x1a1   :  { %v438_v42 = vunpack.c.l.b16 %v428_v29  ;;  %v296_v19 = vpack.c.bf16 %v203_v22, %v201_v26 }
 0x1a3   :  { %v439_v43 = vpack.c.b16 %v438_v42, %v437_v41  ;;  %v2020_v41 = vunpack.c.l.bf16 %v1673_v31 }
 0x1a5   :  { %v1958_v48 = vunpack.c.l.bf16 %v439_v43  ;;  %v1960_v49 = vunpack.c.h.bf16 %v439_v43  ;;  %v272_v50 = vpop.f32.mrf.mxu2  ;;  %v1611_v43 = vld [vmem:[%s2498_s7] sm:$0xff] }
 0x1a6   :  { %v430_v51 = vpack.c.bf16 %v272_v50, %v272_v50  ;;  %v205_v52 = vpop.f32.mrf.mxu0  ;;  %v240_v53 = vpop.f32.mrf.mxu1 }
 0x1a7   :  { %v479_v54 = vmul.f32 %v1951_v44, %v1958_v48  ;;  %v480_v55 = vmul.f32 %v1953_v45, %v1960_v49  ;;  %v477_v63 = vmul.f32 %v1966_v56, %v1958_v48  ;;  %v478_v0 = vmul.f32 %v1968_v57, %v1960_v49 }
 0x1a8   :  { %v444_v59 = vunpack.c.l.b16 %v430_v51  ;;  %v830_v5 = vpack.c.bf16 %v240_v53, %v240_v53  ;;  %v206_v13 = vadd.f32 %v1701_v4, %v205_v52  ;;  %v475_v27 = vmul.f32 %v1989_v11, %v1958_v48  ;;  %v1672_v51 = vld [vmem:[%s2499_s8 + $0x10] sm:$0xff]  }
 0x1a9   :  { %v488_v60 = vpack.c.bf16 %v480_v55, %v479_v54  ;;  %v487_v16 = vpack.c.bf16 %v478_v0, %v477_v63  ;;  %v476_v35 = vmul.f32 %v1991_v12, %v1960_v49  ;;  %v473_v47 = vmul.f32 %v2002_v28, %v1958_v48 }
 0x1aa   :  { %v445_v61 = vpack.c.b16 %v444_v59, %v443_v58  ;;  %v840_v23 = vunpack.c.l.b16 %v830_v5  ;;  %v474_v50 = vmul.f32 %v2004_v30, %v1960_v49  ;;  %v2042_v63 = vunpack.c.l.bf16 %v1672_v51 }
 0x1ab   :  { %v550_v62 = vsel %vm515_vm14, %v488_v60, 0  ;;  %v547_v34 = vsel %vm515_vm14, %v487_v16, 0  ;;  %v486_v53 = vpack.c.bf16 %v476_v35, %v475_v27  ;;  %v2046_v0 = vmul.f32 %v2020_v41, %v1958_v48 }
 0x1ac   :  { %v1978_v2 = vunpack.c.l.bf16 %v445_v61  ;;  %v1980_v3 = vunpack.c.h.bf16 %v445_v61  ;;  %552 = vmatpush.bf16.xpose.msrb.mxu0 %v550_v62  ;;  %v2049_v5 = vunpack.c.h.bf16 %v1672_v51 }
 0x1ad   :  { %v275_v6 = vpop.f32.mrf.mxu2 }
 0x1ae   :  { %v207_v7 = vpop.f32.mrf.mxu0  ;;  %v242_v8 = vpop.f32.mrf.mxu1  ;;  %v505_v9 = vmul.f32 %v1951_v44, %v1978_v2  ;;  %v506_v10 = vmul.f32 %v1953_v45, %v1980_v3  ;;  %v503_v20 = vmul.f32 %v1966_v56, %v1978_v2  ;;  %v504_v21 = vmul.f32 %v1968_v57, %v1980_v3 }
 0x1af   :  { %v208_v14 = vadd.f32 %v1701_v4, %v207_v7  ;;  %v831_v15 = vpack.c.bf16 %v242_v8, %v242_v8  ;;  %v832_v32 = vpack.c.bf16 %v275_v6, %v275_v6  ;;  %v501_v37 = vmul.f32 %v1989_v11, %v1978_v2 }
 0x1b0   :  { %v514_v18 = vpack.c.bf16 %v506_v10, %v505_v9  ;;  %v513_v36 = vpack.c.bf16 %v504_v21, %v503_v20  ;;  %v502_v38 = vmul.f32 %v1991_v12, %v1980_v3  ;;  %v499_v60 = vmul.f32 %v2002_v28, %v1978_v2 }
 0x1b1   :  { %v841_v24 = vunpack.c.l.b16 %v831_v15  ;;  %v297_v25 = vpack.c.bf16 %v208_v14, %v206_v13  ;;  %v846_v52 = vunpack.c.l.b16 %v832_v32  ;;  %v500_v61 = vmul.f32 %v2004_v30, %v1980_v3  ;;  %v1671_v13 = vld [vmem:[%s2499_s8 + $0x8] sm:$0xff]  }
 0x1b2   :  { %734 = vmatpush.bf16.msrb.mxu2 %v514_v18  ;;  %v512_v59 = vpack.c.bf16 %v502_v38, %v501_v37  ;;  %v485_v4 = vpack.c.bf16 %v474_v50, %v473_v47  ;;  %v2053_v6 = vmul.f32 %v2025_v46, %v1960_v49  ;;  %v544_v7 = vsel %vm515_vm14, %v486_v53, 0  ;;  %v1640_v18 = vld [vmem:[%s2499_s8] sm:$0xff]  }
 0x1b3   :  { %v842_v33 = vpack.c.b16 %v841_v24, %v840_v23  ;;  %368 = vmatpush.bf16.msra.mxu3 %v297_v25  ;;  %v511_v15 = vpack.c.bf16 %v500_v61, %v499_v60  ;;  %v497_v16 = vmul.f32 %v2020_v41, %v1978_v2  ;;  %v498_v17 = vmul.f32 %v2025_v46, %v1980_v3 }
 0x1b4   :  { %553 = vmatpush.bf16.xpose.msrb.mxu0 %v547_v34  ;;  %v495_v21 = vmul.f32 %v2042_v63, %v1978_v2  ;;  %v496_v22 = vmul.f32 %v2049_v5, %v1980_v3  ;;  %v2078_v23 = vunpack.c.l.bf16 %v1671_v13  ;;  %v2080_v25 = vunpack.c.h.bf16 %v1671_v13 }
 0x1b5   :  { %v2016_v39 = vunpack.c.l.bf16 %v842_v33  ;;  %v2018_v40 = vunpack.c.h.bf16 %v842_v33  ;;  %v277_v29 = vpop.f32.mrf.mxu2  ;;  %v484_v26 = vpack.c.bf16 %v2053_v6, %v2046_v0  ;;  %v2084_v27 = vunpack.c.l.bf16 %v1640_v18 }
 0x1b6   :  { %v833_v42 = vpack.c.bf16 %v277_v29, %v277_v29  ;;  %735 = vmatpush.bf16.msrb.mxu2 %v513_v36  ;;  %v510_v31 = vpack.c.bf16 %v498_v17, %v497_v16  ;;  %v541_v32 = vsel %vm515_vm14, %v485_v4, 0  ;;  %v493_v33 = vmul.f32 %v2078_v23, %v1978_v2 }
 0x1b7   :  { %369 = vmatpush.bf16.msra.mxu3 %v296_v19  ;;  %v866_v54 = vmul.f32 %v1951_v44, %v2016_v39  ;;  %v867_v55 = vmul.f32 %v1953_v45, %v2018_v40  ;;  %v864_v9 = vmul.f32 %v1966_v56, %v2016_v39  ;;  %v865_v10 = vmul.f32 %v1968_v57, %v2018_v40 }
 0x1b8   :  { %v847_v58 = vunpack.c.l.b16 %v833_v42  ;;  %v509_v35 = vpack.c.bf16 %v496_v22, %v495_v21  ;;  %v494_v36 = vmul.f32 %v2080_v25, %v1980_v3  ;;  %v491_v37 = vmul.f32 %v2084_v27, %v1978_v2 }
 0x1b9   :  { %v875_v62 = vpack.c.bf16 %v867_v55, %v866_v54  ;;  %v874_v24 = vpack.c.bf16 %v865_v10, %v864_v9  ;;  %v862_v29 = vmul.f32 %v1989_v11, %v2016_v39  ;;  %v863_v19 = vmul.f32 %v1991_v12, %v2018_v40  ;;  %v1612_v54 = vld [vmem:[%s2498_s7 + $0x8] sm:$0xff] }
 0x1ba   :  { %v848_v1 = vpack.c.b16 %v847_v58, %v846_v52  ;;  %736 = vmatpush.bf16.msrb.mxu2 %v512_v59  ;;  %1493 = vmatmul.msk.bf16.vlgmr.msra.gmra.mxu3 %vm51_vm0, %v1611_v43  ;;  %v508_v4 = vpack.c.bf16 %v494_v36, %v493_v33  ;;  %v469_v13 = vmul.f32 %v2042_v63, %v1958_v48 }
 0x1bb   :  { %v2057_v8 = vsel %vm515_vm14, %v875_v62, 0  ;;  %v2110_v43 = vsel %vm515_vm14, %v874_v24, 0  ;;  %v873_v61 = vpack.c.bf16 %v863_v19, %v862_v29  ;;  %v860_v16 = vmul.f32 %v2002_v28, %v2016_v39 }
 0x1bc   :  { %v876_v14 = vunpack.c.l.bf16 %v848_v1  ;;  %554 = vmatpush.bf16.xpose.msrb.mxu0 %v544_v7  ;;  %1679 = vmatpush.bf16.xpose.msrb.mxu3 %v2057_v8  ;;  %v877_v20 = vunpack.c.h.bf16 %v848_v1  ;;  %v861_v17 = vmul.f32 %v2004_v30, %v2018_v40  ;;  %v467_v24 = vmul.f32 %v2078_v23, %v1958_v48 }
 0x1bd   :  { %v465_v36 = vmul.f32 %v2084_v27, %v1958_v48  ;;  %v856_v29 = vmul.f32 %v2042_v63, %v2016_v39  ;;  %v857_v19 = vmul.f32 %v2049_v5, %v2018_v40 }
 0x1be   :  { %737 = vmatpush.bf16.msrb.mxu2 %v511_v15  ;;  %v2090_v34 = vmul.f32 %v1951_v44, %v876_v14  ;;  %v2097_v38 = vmul.f32 %v1953_v45, %v877_v20  ;;  %v2104_v44 = vmul.f32 %v1966_v56, %v876_v14  ;;  %v2107_v42 = vmul.f32 %v1968_v57, %v877_v20 }
 0x1bf   :  { %v2115_v2 = vmul.f32 %v1989_v11, %v876_v14  ;;  %v2118_v47 = vmul.f32 %v1991_v12, %v877_v20  ;;  %v2121_v56 = vunpack.c.h.bf16 %v1640_v18  ;;  %v2126_v50 = vmul.f32 %v2002_v28, %v876_v14 }
 0x1c0   :  { %v901_v45 = vpack.c.bf16 %v2097_v38, %v2090_v34  ;;  %v900_v57 = vpack.c.bf16 %v2107_v42, %v2104_v44  ;;  %v2129_v51 = vmul.f32 %v2004_v30, %v877_v20  ;;  %v2134_v12 = vmul.f32 %v2020_v41, %v876_v14 }
 0x1c1   :  { %v899_v11 = vpack.c.bf16 %v2118_v47, %v2115_v2  ;;  %v2137_v52 = vmul.f32 %v2025_v46, %v877_v20  ;;  %v2140_v53 = vmul.f32 %v2042_v63, %v876_v14  ;;  %v2148_v58 = vmul.f32 %v2049_v5, %v877_v20  ;;  %v1614_v63 = vld [vmem:[%s2498_s7 + $0x18] sm:$0xff] }
 0x1c2   :  { %738 = vmatpush.bf16.msrb.mxu2 %v510_v31  ;;  %v898_v55 = vpack.c.bf16 %v2129_v51, %v2126_v50  ;;  %v2151_v59 = vmul.f32 %v2078_v23, %v876_v14  ;;  %v2154_v60 = vmul.f32 %v2080_v25, %v877_v20  ;;  %v2159_v0 = vmul.f32 %v2084_v27, %v876_v14 }
 0x1c3   :  { %v897_v62 = vpack.c.bf16 %v2137_v52, %v2134_v12  ;;  %v2162_v1 = vmul.f32 %v2121_v56, %v877_v20  ;;  %v492_v6 = vmul.f32 %v2121_v56, %v1980_v3  ;;  %v896_v7 = vpack.c.bf16 %v2148_v58, %v2140_v53 }
 0x1c4   :  { %555 = vmatpush.bf16.xpose.msrb.mxu0 %v541_v32  ;;  %1681 = vmatpush.bf16.xpose.msrb.mxu3 %v2110_v43  ;;  %v895_v9 = vpack.c.bf16 %v2154_v60, %v2151_v59  ;;  %v470_v14 = vmul.f32 %v2049_v5, %v1960_v49  ;;  %v538_v3 = vsel %vm515_vm14, %v484_v26, 0  ;;  %v930_v15 = vsel %vm515_vm14, %v873_v61, 0  ;;  %v1613_v32 = vld [vmem:[%s2498_s7 + $0x10] sm:$0xff] }
 0x1c5   :  { %v894_v10 = vpack.c.bf16 %v2162_v1, %v2159_v0  ;;  %v507_v18 = vpack.c.bf16 %v492_v6, %v491_v37  ;;  %v872_v21 = vpack.c.bf16 %v861_v17, %v860_v16  ;;  %v468_v28 = vmul.f32 %v2080_v25, %v1960_v49 }
 0x1c6   :  { %739 = vmatpush.bf16.msrb.mxu2 %v509_v35  ;;  %v483_v20 = vpack.c.bf16 %v470_v14, %v469_v13  ;;  %v858_v30 = vmul.f32 %v2020_v41, %v2016_v39  ;;  %v859_v31 = vmul.f32 %v2025_v46, %v2018_v40  ;;  %v466_v41 = vmul.f32 %v2121_v56, %v1960_v49 }
 0x1c7   :  { %v927_v26 = vsel %vm515_vm14, %v872_v21, 0  ;;  %v482_v33 = vpack.c.bf16 %v468_v28, %v467_v24  ;;  %v870_v61 = vpack.c.bf16 %v857_v19, %v856_v29  ;;  %v854_v49 = vmul.f32 %v2078_v23, %v2016_v39  ;;  %v1625_v21 = vld [vmem:[%s2500_s9 + $0x30] sm:$0xff] }
 0x1c8   :  { %v535_v22 = vsel %vm515_vm14, %v483_v20, 0  ;;  %v871_v35 = vpack.c.bf16 %v859_v31, %v858_v30  ;;  %v855_v6 = vmul.f32 %v2080_v25, %v2018_v40  ;;  %v852_v23 = vmul.f32 %v2084_v27, %v2016_v39  ;;  %v1615_v39 = vld [vmem:[%s2498_s7 + $0x20] sm:$0xff]  ;;  %v1626_v20 = vld [vmem:[%s2500_s9 + $0x38] sm:$0xff] }
 0x1c9   :  { %v532_v46 = vsel %vm515_vm14, %v482_v33, 0  ;;  %v853_v25 = vmul.f32 %v2121_v56, %v2018_v40  ;;  %v1616_v40 = vld [vmem:[%s2498_s7 + $0x28] sm:$0xff]  ;;  %v1617_v56 = vld [vmem:[%s2498_s7 + $0x30] sm:$0xff]  ;;  %689 = vmatpush.bf16.msrb.mxu1 %v1626_v20  ;;  %v1623_v33 = vld [vmem:[%s2500_s9 + $0x20] sm:$0xff] }
 0x1ca   :  { %740 = vmatpush.bf16.msrb.mxu2 %v508_v4  ;;  %1494 = vmatmul.msk.bf16.gmra.mxu3 %vm51_vm0, %v1612_v54  ;;  %v924_v37 = vsel %vm515_vm14, %v871_v35, 0  ;;  %v481_v54 = vpack.c.bf16 %v466_v41, %v465_v36  ;;  %v921_v4 = vsel %vm515_vm14, %v870_v61, 0  ;;  %v869_v5 = vpack.c.bf16 %v855_v6, %v854_v49  ;;  %v1622_v35 = vld [vmem:[%s2500_s9 + $0x18] sm:$0xff]  ;;  %v1621_v36 = vld [vmem:[%s2500_s9 + $0x10] sm:$0xff]  ;;  %v1620_v41 = vld [vmem:[%s2500_s9 + $0x8] sm:$0xff] }
 0x1cc   :  { %556 = vmatpush.bf16.xpose.msrb.mxu0 %v538_v3  ;;  %1683 = vmatpush.bf16.xpose.msrb.mxu3 %v930_v15  ;;  %v529_v48 = vsel %vm515_vm14, %v481_v54, 0  ;;  %v918_v13 = vsel %vm515_vm14, %v869_v5, 0 }
 0x1cd   :  { %690 = vmatpush.bf16.msrb.mxu1 %v1625_v21 }
 0x1ce   :  { %741 = vmatpush.bf16.msrb.mxu2 %v507_v18 }
 0x1d2   :  { %1678 = vmatpush.bf16.xpose.msra.mxu2 %v2057_v8 }
 0x1d4   :  { %557 = vmatpush.bf16.xpose.msrb.mxu0 %v535_v22  ;;  %1685 = vmatpush.bf16.xpose.msrb.mxu3 %v927_v26 }
 0x1da   :  { %1680 = vmatpush.bf16.xpose.msra.mxu2 %v2110_v43  ;;  %1495 = vmatmul.msk.bf16.gmra.mxu3 %vm51_vm0, %v1613_v32 }
 0x1dc   :  { %558 = vmatpush.bf16.xpose.msrb.mxu0 %v532_v46  ;;  %1687 = vmatpush.bf16.xpose.msrb.mxu3 %v924_v37  ;;  %v1619_v46 = vld [vmem:[%s2500_s9] sm:$0xff] }
 0x1e2   :  { %1682 = vmatpush.bf16.xpose.msra.mxu2 %v930_v15 }
 0x1e4   :  { %559 = vmatpush.bf16.xpose.msrb.mxu0 %v529_v48  ;;  %1689 = vmatpush.bf16.xpose.msrb.mxu3 %v921_v4 }
 0x1ea   :  { %1684 = vmatpush.bf16.xpose.msra.mxu2 %v927_v26  ;;  %1496 = vmatmul.msk.bf16.gmra.mxu3 %vm51_vm0, %v1614_v63 }
 0x1ec   :  { %938 = vmatpush.bf16.xpose.msra.mxu0 %v2057_v8  ;;  %1691 = vmatpush.bf16.xpose.msrb.mxu3 %v918_v13  ;;  %v868_v8 = vpack.c.bf16 %v853_v25, %v852_v23 }
 0x1ee   :  { %v915_v14 = vsel %vm515_vm14, %v868_v8, 0 }
 0x1f2   :  { %1686 = vmatpush.bf16.xpose.msra.mxu2 %v924_v37 }
 0x1f4   :  { %939 = vmatpush.bf16.xpose.msra.mxu0 %v2110_v43  ;;  %1693 = vmatpush.bf16.xpose.msrb.mxu3 %v915_v14 }
 0x1fa   :  { %1688 = vmatpush.bf16.xpose.msra.mxu2 %v921_v4  ;;  %1497 = vmatmul.msk.bf16.gmra.mxu3 %vm51_vm0, %v1615_v39  ;;  %v1633_v39 = vld [vmem:[%s2500_s9 + $0x30] sm:$0xff] }
 0x1fc   :  { %940 = vmatpush.bf16.xpose.msra.mxu0 %v930_v15  ;;  %1120 = vmatpush.bf16.msra.mxu3 %v901_v45 }
 0x200   :  { %1121 = vmatpush.bf16.msra.mxu3 %v900_v57 }
 0x202   :  { %1690 = vmatpush.bf16.xpose.msra.mxu2 %v918_v13 }
 0x204   :  { %941 = vmatpush.bf16.xpose.msra.mxu0 %v927_v26  ;;  %1122 = vmatpush.bf16.msra.mxu3 %v899_v11  ;;  %v1618_v11 = vld [vmem:[%s2498_s7 + $0x38] sm:$0xff]  ;;  %v1624_v26 = vld [vmem:[%s2500_s9 + $0x28] sm:$0xff] }
 0x205   :  { %691 = vmatpush.bf16.msrb.mxu1 %v1624_v26 }
 0x208   :  { %1123 = vmatpush.bf16.msra.mxu3 %v898_v55 }
 0x209   :  { %692 = vmatpush.bf16.msrb.mxu1 %v1623_v33 }
 0x20a   :  { %1692 = vmatpush.bf16.xpose.msra.mxu2 %v915_v14  ;;  %1498 = vmatmul.msk.bf16.gmra.mxu3 %vm51_vm0, %v1616_v40  ;;  %v1632_v40 = vld [vmem:[%s2500_s9 + $0x28] sm:$0xff] }
 0x20c   :  { %942 = vmatpush.bf16.xpose.msra.mxu0 %v924_v37  ;;  %1124 = vmatpush.bf16.msra.mxu3 %v897_v62 }
 0x20d   :  { %693 = vmatpush.bf16.msrb.mxu1 %v1622_v35 }
 0x210   :  { %1125 = vmatpush.bf16.msra.mxu3 %v896_v7 }
 0x211   :  { %694 = vmatpush.bf16.msrb.mxu1 %v1621_v36 }
 0x214   :  { %943 = vmatpush.bf16.xpose.msra.mxu0 %v921_v4  ;;  %1126 = vmatpush.bf16.msra.mxu3 %v895_v9 }
 0x215   :  { %695 = vmatpush.bf16.msrb.mxu1 %v1620_v41 }
 0x218   :  { %1127 = vmatpush.bf16.msra.mxu3 %v894_v10 }
 0x219   :  { %696 = vmatpush.bf16.msrb.mxu1 %v1619_v46 }
 0x21a   :  { %1499 = vmatmul.msk.bf16.gmra.mxu3 %vm51_vm0, %v1617_v56 }
 0x21c   :  { %944 = vmatpush.bf16.xpose.msra.mxu0 %v918_v13  ;;  %v1634_v13 = vld [vmem:[%s2500_s9 + $0x38] sm:$0xff] }
 0x224   :  { %945 = vmatpush.bf16.xpose.msra.mxu0 %v915_v14 }
 0x22a   :  { %1500 = vmatmul.msk.bf16.gmra.mxu3 %vm51_vm0, %v1618_v11  ;;  %vm768_vm0 = vcmask 64512  }
 0x23d   :  { %v371_v27 = vpop.f32.mrf.mxu3 }
 0x245   :  { %v373_v34 = vpop.f32.mrf.mxu3 }
 0x246   :  { %v431_v38 = vpack.c.bf16 %v373_v34, %v371_v27 }
 0x248   :  { %1501 = vmatmul.msk.bf16.vlgmr.msrb.gmra.mxu0 %vm515_vm14, %v431_v38 }
 0x249   :  { %1075 = vmatpush.bf16.msrb.mxu0 %v1634_v13 }
 0x24d   :  { %v376_v44 = vpop.f32.mrf.mxu3  ;;  %1076 = vmatpush.bf16.msrb.mxu0 %v1633_v39 }
 0x251   :  { %1077 = vmatpush.bf16.msrb.mxu0 %v1632_v40 }
 0x255   :  { %v378_v42 = vpop.f32.mrf.mxu3 }
 0x256   :  { %v432_v43 = vpack.c.bf16 %v378_v42, %v376_v44  ;;  %v1631_v44 = vld [vmem:[%s2500_s9 + $0x20] sm:$0xff] }
 0x257   :  { %1078 = vmatpush.bf16.msrb.mxu0 %v1631_v44 }
 0x258   :  { %1502 = vmatmul.msk.bf16.gmra.mxu0 %vm515_vm14, %v432_v43 }
 0x25d   :  { %v381_v45 = vpop.f32.mrf.mxu3 }
 0x265   :  { %v383_v2 = vpop.f32.mrf.mxu3 }
 0x266   :  { %v433_v47 = vpack.c.bf16 %v383_v2, %v381_v45  ;;  %v1630_v45 = vld [vmem:[%s2500_s9 + $0x18] sm:$0xff] }
 0x267   :  { %1079 = vmatpush.bf16.msrb.mxu0 %v1630_v45 }
 0x268   :  { %1503 = vmatmul.msk.bf16.gmra.mxu0 %vm515_vm14, %v433_v47 }
 0x26d   :  { %v386_v57 = vpop.f32.mrf.mxu3 }
 0x275   :  { %v388_v50 = vpop.f32.mrf.mxu3 }
 0x276   :  { %v434_v51 = vpack.c.bf16 %v388_v50, %v386_v57  ;;  %v1629_v50 = vld [vmem:[%s2500_s9 + $0x10] sm:$0xff] }
 0x277   :  { %1080 = vmatpush.bf16.msrb.mxu0 %v1629_v50  ;;  %v1153_v50 = vld [vmem:[%s2501_s10] sm:$0xf] }
 0x278   :  { %1504 = vmatmul.msk.bf16.gmra.mxu0 %vm515_vm14, %v434_v51  ;;  %v1628_v51 = vld [vmem:[%s2500_s9 + $0x8] sm:$0xff] }
 0x27b   :  { %1081 = vmatpush.bf16.msrb.mxu0 %v1628_v51  ;;  %v1167_v51 = vsel %vm781_vm15, %v1153_v50, 0 }
 0x27d   :  { %v391_v12 = vpop.f32.mrf.mxu3 }
 0x285   :  { %v393_v52 = vpop.f32.mrf.mxu3 }
 0x286   :  { %v834_v53 = vpack.c.bf16 %v393_v52, %v391_v12 }
 0x288   :  { %1541 = vmatmul.msk.bf16.vlgmr.msra.gmra.mxu0 %vm515_vm14, %v834_v53  ;;  %v1627_v53 = vld [vmem:[%s2500_s9] sm:$0xff] }
 0x289   :  { %1082 = vmatpush.bf16.msrb.mxu0 %v1627_v53 }
 0x28d   :  { %v396_v55 = vpop.f32.mrf.mxu3 }
 0x295   :  { %v398_v58 = vpop.f32.mrf.mxu3 }
 0x296   :  { %v835_v59 = vpack.c.bf16 %v398_v58, %v396_v55 }
 0x298   :  { %1542 = vmatmul.msk.bf16.gmra.mxu0 %vm515_vm14, %v835_v59 }
 0x29d   :  { %v2276_v9 = vpop.f32.mrf.mxu3 }
 0x2a5   :  { %v2281_v3 = vpop.f32.mrf.mxu3 }
 0x2a6   :  { %v836_v15 = vpack.c.bf16 %v2281_v3, %v2276_v9  ;;  %v767_v9 = vld [vmem:[%s2501_s10] sm:$0xf] }
 0x2a7   :  { %v783_v3 = vsel %vm781_vm15, %v767_v9, 0 }
 0x2a8   :  { %792 = vmatpush.bf16.msra.mxu1 %v783_v3 }
 0x2ad   :  { %v406_v17 = vpop.f32.mrf.mxu3 }
 0x2b5   :  { %v408_v22 = vpop.f32.mrf.mxu3 }
 0x2b6   :  { %v837_v24 = vpack.c.bf16 %v408_v22, %v406_v17 }
 0x2b8   :  { %1544 = vmatmul.msk.bf16.vlgmr.msrb.gmra.mxu3 %vm515_vm14, %v837_v24 }
 0x2c5   :  { %v561_v60 = vpop.f32.mrf.mxu0 }
 0x2c6   :  { %581 = vmax.xlane.f32.xlu2 %v561_v60 }
 0x2cd   :  { %v563_v62 = vpop.f32.mrf.mxu0 }
 0x2ce   :  { %583 = vmax.xlane.f32.xlu0 %v563_v62 }
 0x2d5   :  { %v566_v0 = vpop.f32.mrf.mxu0 }
 0x2d6   :  { %585 = vmax.xlane.f32.xlu1 %v566_v0 }
 0x2dd   :  { %v568_v1 = vpop.f32.mrf.mxu0 }
 0x2de   :  { %587 = vmax.xlane.f32.xlu2 %v568_v1 }
 0x2e5   :  { %v2273_v7 = vpop.f32.mrf.mxu0 }
 0x2e6   :  { %589 = vmax.xlane.f32.xlu0 %v2273_v7 }
 0x2ed   :  { %v2278_v10 = vpop.f32.mrf.mxu0 }
 0x2ee   :  { %591 = vmax.xlane.f32.xlu1 %v2278_v10 }
 0x2f5   :  { %v2285_v16 = vpop.f32.mrf.mxu0 }
 0x2f6   :  { %593 = vmax.xlane.f32.xlu2 %v2285_v16 }
 0x2fd   :  { %v2288_v18 = vpop.f32.mrf.mxu0 }
 0x2fe   :  { %595 = vmax.xlane.f32.xlu0 %v2288_v18 }
 0x305   :  { %v2300_v28 = vpop.f32.mrf.mxu0 }
 0x306   :  { %967 = vmax.xlane.f32.xlu1 %v2300_v28 }
 0x30d   :  { %v2304_v30 = vpop.f32.mrf.mxu0 }
 0x30e   :  { %969 = vmax.xlane.f32.xlu2 %v2304_v30 }
 0x315   :  { %v2307_v31 = vpop.f32.mrf.mxu0 }
 0x316   :  { %971 = vmax.xlane.f32.xlu0 %v2307_v31 }
 0x31d   :  { %v2310_v32 = vpop.f32.mrf.mxu0 }
 0x31e   :  { %973 = vmax.xlane.f32.xlu1 %v2310_v32 }
 0x339   :  { %v582_v37 = vpop.xlane.xlu2 %581 }
 0x33a   :  { %v597_v29 = vsub.f32 %v561_v60, %v582_v37 }
 0x33c   :  { %v605_v19 = vmul.f32 1.442695, %v597_v29 }
 0x33e   :  { %1713 = vpow2.f32 %v605_v19 }
 0x341   :  { %v584_v54 = vpop.xlane.xlu0 %583 }
 0x342   :  { %v598_v61 = vsub.f32 %v563_v62, %v584_v54 }
 0x344   :  { %v607_v48 = vmul.f32 1.442695, %v598_v61  ;;  %v1714_v49 = vpop.eup %1713 }
 0x346   :  { %1715 = vpow2.f32 %v607_v48 }
 0x349   :  { %v586_v4 = vpop.xlane.xlu1 %585 }
 0x34a   :  { %v599_v63 = vsub.f32 %v566_v0, %v586_v4 }
 0x34c   :  { %v1716_v6 = vpop.eup %1715  ;;  %v609_v23 = vmul.f32 1.442695, %v599_v63 }
 0x34d   :  { %v621_v5 = vpack.c.bf16 %v1716_v6, %v1714_v49 }
 0x34e   :  { %1717 = vpow2.f32 %v609_v23 }
 0x34f   :  { %697 = vmatmul.bf16.vlgmr.msrb.gmra.mxu1 %v621_v5  ;;  %742 = vmatmul.bf16.vlgmr.msrb.gmra.mxu2 %v621_v5 }
 0x350   :  { %1176 = vmatpush.bf16.msrb.mxu1 %v1167_v51 }
 0x351   :  { %v588_v25 = vpop.xlane.xlu2 %587 }
 0x352   :  { %v600_v8 = vsub.f32 %v568_v1, %v588_v25 }
 0x354   :  { %v611_v14 = vmul.f32 1.442695, %v600_v8  ;;  %v1718_v34 = vpop.eup %1717 }
 0x356   :  { %1719 = vpow2.f32 %v611_v14 }
 0x359   :  { %v590_v27 = vpop.xlane.xlu0 %589 }
 0x35a   :  { %v601_v42 = vsub.f32 %v2273_v7, %v590_v27 }
 0x35c   :  { %v1720_v38 = vpop.eup %1719  ;;  %v613_v2 = vmul.f32 1.442695, %v601_v42 }
 0x35d   :  { %v622_v43 = vpack.c.bf16 %v1720_v38, %v1718_v34 }
 0x35e   :  { %1721 = vpow2.f32 %v613_v2 }
 0x35f   :  { %702 = vmatmul.bf16.gmra.mxu1 %v622_v43  ;;  %747 = vmatmul.bf16.gmra.mxu2 %v622_v43 }
 0x361   :  { %v592_v47 = vpop.xlane.xlu1 %591 }
 0x362   :  { %v602_v56 = vsub.f32 %v2278_v10, %v592_v47 }
 0x364   :  { %v615_v57 = vmul.f32 1.442695, %v602_v56  ;;  %v1722_v12 = vpop.eup %1721 }
 0x366   :  { %1723 = vpow2.f32 %v615_v57 }
 0x369   :  { %v594_v11 = vpop.xlane.xlu2 %593 }
 0x36a   :  { %v603_v55 = vsub.f32 %v2285_v16, %v594_v11 }
 0x36c   :  { %v1724_v52 = vpop.eup %1723  ;;  %v617_v59 = vmul.f32 1.442695, %v603_v55 }
 0x36d   :  { %v623_v58 = vpack.c.bf16 %v1724_v52, %v1722_v12 }
 0x36e   :  { %1725 = vpow2.f32 %v617_v59 }
 0x36f   :  { %707 = vmatmul.bf16.gmra.mxu1 %v623_v58  ;;  %752 = vmatmul.bf16.gmra.mxu2 %v623_v58 }
 0x371   :  { %v596_v60 = vpop.xlane.xlu0 %595 }
 0x372   :  { %v604_v62 = vsub.f32 %v2288_v18, %v596_v60  ;;  %v2358_v18 = vpop.f32.mrf.mxu3 }
 0x373   :  { %979 = vmax.xlane.f32.xlu1 %v2358_v18 }
 0x374   :  { %v619_v0 = vmul.f32 1.442695, %v604_v62  ;;  %v1726_v7 = vpop.eup %1725 }
 0x376   :  { %1727 = vpow2.f32 %v619_v0 }
 0x379   :  { %v968_v1 = vpop.xlane.xlu1 %967 }
 0x37a   :  { %v983_v17 = vsub.f32 %v2300_v28, %v968_v1 }
 0x37c   :  { %v1728_v10 = vpop.eup %1727  ;;  %v991_v16 = vmul.f32 1.442695, %v983_v17  ;;  %v2398_v17 = vpop.f32.mrf.mxu3 }
 0x37d   :  { %v624_v20 = vpack.c.bf16 %v1728_v10, %v1726_v7 }
 0x37e   :  { %1729 = vpow2.f32 %v991_v16 }
 0x37f   :  { %712 = vmatmul.bf16.gmra.mxu1 %v624_v20  ;;  %757 = vmatmul.bf16.gmra.mxu2 %v624_v20 }
 0x381   :  { %v970_v21 = vpop.xlane.xlu2 %969 }
 0x382   :  { %v984_v22 = vsub.f32 %v2304_v30, %v970_v21 }
 0x384   :  { %v993_v24 = vmul.f32 1.442695, %v984_v22  ;;  %v1730_v33 = vpop.eup %1729 }
 0x386   :  { %1731 = vpow2.f32 %v993_v24 }
 0x389   :  { %v972_v26 = vpop.xlane.xlu0 %971 }
 0x38a   :  { %v985_v36 = vsub.f32 %v2307_v31, %v972_v26 }
 0x38c   :  { %v1732_v35 = vpop.eup %1731  ;;  %v995_v30 = vmul.f32 1.442695, %v985_v36 }
 0x38d   :  { %v1007_v28 = vpack.c.bf16 %v1732_v35, %v1730_v33 }
 0x38e   :  { %1733 = vpow2.f32 %v995_v30 }
 0x38f   :  { %1543 = vmatmul.msk.bf16.vlgmr.msra.gmra.mxu2 %vm515_vm14, %v836_v15  ;;  %1083 = vmatmul.bf16.vlgmr.msrb.gmra.mxu0 %v1007_v28 }
 0x390   :  { %1128 = vmatmul.bf16.vlgmr.msra.gmra.mxu3 %v1007_v28 }
 0x391   :  { %v974_v41 = vpop.xlane.xlu1 %973 }
 0x392   :  { %v986_v46 = vsub.f32 %v2310_v32, %v974_v41  ;;  %v1638_v41 = vld [vmem:[%s2502_s11 + $0x18] sm:$0xff] }
 0x393   :  { %1318 = vmatpush.bf16.msrb.mxu2 %v1638_v41 }
 0x394   :  { %v997_v37 = vmul.f32 1.442695, %v986_v46  ;;  %v1734_v29 = vpop.eup %1733  ;;  %v1637_v46 = vld [vmem:[%s2502_s11 + $0x10] sm:$0xff] }
 0x396   :  { %1735 = vpow2.f32 %v997_v37  ;;  %v1636_v37 = vld [vmem:[%s2502_s11 + $0x8] sm:$0xff] }
 0x397   :  { %1319 = vmatpush.bf16.msrb.mxu2 %v1637_v46 }
 0x39b   :  { %1320 = vmatpush.bf16.msrb.mxu2 %v1636_v37 }
 0x39c   :  { %v1736_v19 = vpop.eup %1735 }
 0x39d   :  { %v1008_v54 = vpack.c.bf16 %v1736_v19, %v1734_v29  ;;  %v1635_v29 = vld [vmem:[%s2502_s11] sm:$0xff] }
 0x39f   :  { %1088 = vmatmul.bf16.gmra.mxu0 %v1008_v54  ;;  %1321 = vmatpush.bf16.msrb.mxu2 %v1635_v29 }
 0x3a0   :  { %1133 = vmatmul.bf16.gmra.mxu3 %v1008_v54 }
 0x3cc   :  { %v698_v15 = vpop.f32.mrf.mxu1 }
 0x3cd   :  { %v718_v31 = vmax.f32 %v698_v15, 1e-20 }
 0x3cf   :  { %1737 = vrcp.f32 %v718_v31 }
 0x3d2   :  { %v2371_v61 = vpop.f32.mrf.mxu2 }
 0x3d4   :  { %v700_v32 = vpop.f32.mrf.mxu1 }
 0x3d5   :  { %v719_v48 = vmax.f32 %v700_v32, 1e-20  ;;  %v1738_v49 = vpop.eup %1737 }
 0x3d7   :  { %1739 = vrcp.f32 %v719_v48 }
 0x3da   :  { %v2373_v4 = vpop.f32.mrf.mxu2 }
 0x3dc   :  { %v703_v6 = vpop.f32.mrf.mxu1 }
 0x3dd   :  { %v1740_v63 = vpop.eup %1739  ;;  %v720_v13 = vmax.f32 %v703_v6, 1e-20 }
 0x3de   :  { %v763_v5 = vpack.c.bf16 %v1740_v63, %v1738_v49 }
 0x3df   :  { %1741 = vrcp.f32 %v720_v13 }
 0x3e0   :  { %1537 = vmatmul.msk.bf16.vlgmr.msra.gmra.mxu1 %vm768_vm0, %v763_v5 }
 0x3e2   :  { %v2376_v23 = vpop.f32.mrf.mxu2 }
 0x3e4   :  { %v705_v25 = vpop.f32.mrf.mxu1 }
 0x3e5   :  { %v721_v8 = vmax.f32 %v705_v25, 1e-20  ;;  %v1742_v39 = vpop.eup %1741 }
 0x3e7   :  { %1743 = vrcp.f32 %v721_v8 }
 0x3ea   :  { %v2378_v14 = vpop.f32.mrf.mxu2 }
 0x3ec   :  { %v708_v40 = vpop.f32.mrf.mxu1 }
 0x3ed   :  { %v1744_v27 = vpop.eup %1743  ;;  %v722_v38 = vmax.f32 %v708_v40, 1e-20 }
 0x3ee   :  { %v764_v34 = vpack.c.bf16 %v1744_v27, %v1742_v39 }
 0x3ef   :  { %1745 = vrcp.f32 %v722_v38 }
 0x3f0   :  { %1538 = vmatmul.msk.bf16.gmra.mxu1 %vm768_vm0, %v764_v34 }
 0x3f2   :  { %v2381_v44 = vpop.f32.mrf.mxu2 }
 0x3f4   :  { %v710_v42 = vpop.f32.mrf.mxu1 }
 0x3f5   :  { %v723_v43 = vmax.f32 %v710_v42, 1e-20  ;;  %v1746_v2 = vpop.eup %1745 }
 0x3f7   :  { %1747 = vrcp.f32 %v723_v43 }
 0x3fa   :  { %v2383_v45 = vpop.f32.mrf.mxu2 }
 0x3fc   :  { %v713_v47 = vpop.f32.mrf.mxu1 }
 0x3fd   :  { %v1748_v56 = vpop.eup %1747  ;;  %v724_v11 = vmax.f32 %v713_v47, 1e-20 }
 0x3fe   :  { %v765_v57 = vpack.c.bf16 %v1748_v56, %v1746_v2 }
 0x3ff   :  { %1749 = vrcp.f32 %v724_v11 }
 0x400   :  { %1539 = vmatmul.msk.bf16.gmra.mxu1 %vm768_vm0, %v765_v57 }
 0x402   :  { %v2390_v12 = vpop.f32.mrf.mxu2 }
 0x404   :  { %v715_v52 = vpop.f32.mrf.mxu1 }
 0x405   :  { %v725_v53 = vmax.f32 %v715_v52, 1e-20  ;;  %v1750_v58 = vpop.eup %1749 }
 0x407   :  { %1751 = vrcp.f32 %v725_v53 }
 0x40a   :  { %v2392_v55 = vpop.f32.mrf.mxu2 }
 0x40c   :  { %v1084_v59 = vpop.f32.mrf.mxu0 }
 0x40d   :  { %v1752_v60 = vpop.eup %1751  ;;  %v1104_v0 = vmax.f32 %v1084_v59, 1e-20 }
 0x40e   :  { %v766_v62 = vpack.c.bf16 %v1752_v60, %v1750_v58 }
 0x40f   :  { %1753 = vrcp.f32 %v1104_v0  ;;  %v980_v0 = vpop.xlane.xlu1 %979 }
 0x410   :  { %1540 = vmatmul.msk.bf16.gmra.mxu1 %vm768_vm0, %v766_v62 }
 0x412   :  { %v2395_v1 = vpop.f32.mrf.mxu2 }
 0x413   :  { %975 = vmax.xlane.f32.xlu2 %v2395_v1  ;;  %v1129_v60 = vpop.f32.mrf.mxu3 }
 0x414   :  { %v1086_v7 = vpop.f32.mrf.mxu0 }
 0x415   :  { %v1105_v10 = vmax.f32 %v1086_v7, 1e-20  ;;  %v1754_v16 = vpop.eup %1753 }
 0x417   :  { %1755 = vrcp.f32 %v1105_v10 }
 0x41a   :  { %v959_v20 = vpop.f32.mrf.mxu2 }
 0x41b   :  { %977 = vmax.xlane.f32.xlu0 %v959_v20  ;;  %981 = vmax.xlane.f32.xlu2 %v2398_v17 }
 0x41c   :  { %v1089_v21 = vpop.f32.mrf.mxu0 }
 0x41d   :  { %v1756_v22 = vpop.eup %1755  ;;  %v1106_v26 = vmax.f32 %v1089_v21, 1e-20 }
 0x41e   :  { %v1149_v24 = vpack.c.bf16 %v1756_v22, %v1754_v16  ;;  %v989_v22 = vsub.f32 %v2358_v18, %v980_v0 }
 0x41f   :  { %1757 = vrcp.f32 %v1106_v26 }
 0x420   :  { %1577 = vmatmul.msk.bf16.vlgmr.msrb.gmra.mxu1 %vm768_vm0, %v1149_v24 }
 0x424   :  { %v1091_v33 = vpop.f32.mrf.mxu0 }
 0x425   :  { %v1107_v35 = vmax.f32 %v1091_v33, 1e-20  ;;  %v1758_v36 = vpop.eup %1757  ;;  %v1131_v33 = vpop.f32.mrf.mxu3 }
 0x427   :  { %1759 = vrcp.f32 %v1107_v35 }
 0x42d   :  { %v1760_v28 = vpop.eup %1759 }
 0x42e   :  { %v1150_v30 = vpack.c.bf16 %v1760_v28, %v1758_v36 }
 0x430   :  { %1578 = vmatmul.msk.bf16.gmra.mxu1 %vm768_vm0, %v1150_v30 }
 0x45d   :  { %v794_v19 = vpop.f32.mrf.mxu1 }
 0x45e   :  { %v814_v54 = vmul.f32 %v794_v19, %v2371_v61  ;;  %v1134_v19 = vpop.f32.mrf.mxu3 }
 0x460   :  { %v822_v3 = vpack.c.bf16 %v814_v54, %v814_v54 }
 0x462   :  { %v1222_v32 = vunpack.c.l.b16 %v822_v3 }
 0x465   :  { %v796_v9 = vpop.f32.mrf.mxu1 }
 0x466   :  { %v815_v15 = vmul.f32 %v796_v9, %v2373_v4 }
 0x468   :  { %v823_v31 = vpack.c.bf16 %v815_v15, %v815_v15  ;;  %v1136_v15 = vpop.f32.mrf.mxu3 }
 0x46a   :  { %v1223_v48 = vunpack.c.l.b16 %v823_v31 }
 0x46c   :  { %v1230_v49 = vpack.c.b16 %v1223_v48, %v1222_v32 }
 0x46d   :  { %v799_v6 = vpop.f32.mrf.mxu1 }
 0x46e   :  { %1597 = vmatmul.msk.bf16.vlgmr.msrb.gmra.mxu2 %vm515_vm14, %v1230_v49  ;;  %v816_v63 = vmul.f32 %v799_v6, %v2376_v23 }
 0x470   :  { %v824_v13 = vpack.c.bf16 %v816_v63, %v816_v63 }
 0x472   :  { %v1224_v39 = vunpack.c.l.b16 %v824_v13 }
 0x475   :  { %v801_v5 = vpop.f32.mrf.mxu1 }
 0x476   :  { %v817_v25 = vmul.f32 %v801_v5, %v2378_v14 }
 0x478   :  { %v825_v8 = vpack.c.bf16 %v817_v25, %v817_v25 }
 0x47a   :  { %v1225_v61 = vunpack.c.l.b16 %v825_v8 }
 0x47c   :  { %v1231_v40 = vpack.c.b16 %v1225_v61, %v1224_v39 }
 0x47d   :  { %v804_v27 = vpop.f32.mrf.mxu1 }
 0x47e   :  { %1598 = vmatmul.msk.bf16.gmra.mxu2 %vm515_vm14, %v1231_v40  ;;  %v818_v4 = vmul.f32 %v804_v27, %v2381_v44 }
 0x480   :  { %v826_v38 = vpack.c.bf16 %v818_v4, %v818_v4 }
 0x482   :  { %v1226_v23 = vunpack.c.l.b16 %v826_v38 }
 0x485   :  { %v806_v34 = vpop.f32.mrf.mxu1 }
 0x486   :  { %v819_v42 = vmul.f32 %v806_v34, %v2383_v45  ;;  %v976_v43 = vpop.xlane.xlu2 %975 }
 0x487   :  { %v987_v56 = vsub.f32 %v2395_v1, %v976_v43 }
 0x488   :  { %v827_v2 = vpack.c.bf16 %v819_v42, %v819_v42 }
 0x489   :  { %v999_v50 = vmul.f32 1.442695, %v987_v56 }
 0x48a   :  { %v1227_v47 = vunpack.c.l.b16 %v827_v2 }
 0x48b   :  { %1761 = vpow2.f32 %v999_v50 }
 0x48c   :  { %v1232_v14 = vpack.c.b16 %v1227_v47, %v1226_v23 }
 0x48d   :  { %v809_v57 = vpop.f32.mrf.mxu1 }
 0x48e   :  { %1599 = vmatmul.msk.bf16.gmra.mxu2 %vm515_vm14, %v1232_v14  ;;  %v978_v51 = vpop.xlane.xlu0 %977  ;;  %v820_v44 = vmul.f32 %v809_v57, %v2390_v12  ;;  %v982_v58 = vpop.xlane.xlu2 %981  ;;  %v2446_v57 = vld [vmem:[%s2503_s12] ss:$0 sm:$0xff]  ;;  %s1805_s12 = smov [#allocation2]  }
 0x48f   :  { %v988_v11 = vsub.f32 %v959_v20, %v978_v51  ;;  %v990_v10 = vsub.f32 %v2398_v17, %v982_v58  ;;  %s1415_s2 = sshll.u32 %s1805_s12, 4  ;;  %s1416_s2 = int_to_ptr.vmem [resolvable:$true] %s1415_s2 }
 0x490   :  { %v828_v45 = vpack.c.bf16 %v820_v44, %v820_v44 }
 0x491   :  { %v1001_v52 = vmul.f32 1.442695, %v988_v11  ;;  %v1762_v62 = vpop.eup %1761  ;;  %v1005_v12 = vmul.f32 1.442695, %v990_v10 }
 0x492   :  { %v1228_v16 = vunpack.c.l.b16 %v828_v45 }
 0x493   :  { %1763 = vpow2.f32 %v1001_v52 }
 0x494   :  { %1765 = vpow2.f32 %v1005_v12 }
 0x495   :  { %v811_v53 = vpop.f32.mrf.mxu1 }
 0x496   :  { %v821_v59 = vmul.f32 %v811_v53, %v2392_v55  ;;  %v1003_v55 = vmul.f32 1.442695, %v989_v22 }
 0x498   :  { %v829_v1 = vpack.c.bf16 %v821_v59, %v821_v59  ;;  %1767 = vpow2.f32 %v1003_v55 }
 0x499   :  { %v1764_v7 = vpop.eup %1763 }
 0x49a   :  { %v1229_v21 = vunpack.c.l.b16 %v829_v1  ;;  %v1009_v20 = vpack.c.bf16 %v1764_v7, %v1762_v62  ;;  %v1766_v30 = vpop.eup %1765 }
 0x49c   :  { %v1233_v24 = vpack.c.b16 %v1229_v21, %v1228_v16  ;;  %1093 = vmatmul.bf16.gmra.mxu0 %v1009_v20  ;;  %1138 = vmatmul.bf16.gmra.mxu3 %v1009_v20 }
 0x49d   :  { %v1178_v26 = vpop.f32.mrf.mxu1 }
 0x49e   :  { %1600 = vmatmul.msk.bf16.gmra.mxu2 %vm515_vm14, %v1233_v24  ;;  %v1198_v35 = vmul.f32 %v1178_v26, %v1129_v60  ;;  %v1768_v46 = vpop.eup %1767 }
 0x49f   :  { %v1010_v29 = vpack.c.bf16 %v1766_v30, %v1768_v46 }
 0x4a0   :  { %v1206_v28 = vpack.c.bf16 %v1198_v35, %v1198_v35 }
 0x4a2   :  { %v1242_v37 = vunpack.c.l.b16 %v1206_v28 }
 0x4a5   :  { %v1180_v36 = vpop.f32.mrf.mxu1 }
 0x4a6   :  { %v1199_v17 = vmul.f32 %v1180_v36, %v1131_v33 }
 0x4a8   :  { %v1207_v41 = vpack.c.bf16 %v1199_v17, %v1199_v17 }
 0x4aa   :  { %v1243_v18 = vunpack.c.l.b16 %v1207_v41 }
 0x4ac   :  { %v1250_v54 = vpack.c.b16 %v1243_v18, %v1242_v37  ;;  %1098 = vmatmul.bf16.gmra.mxu0 %v1010_v29  ;;  %1143 = vmatmul.bf16.gmra.mxu3 %v1010_v29 }
 0x4ad   :  { %v1183_v9 = vpop.f32.mrf.mxu1 }
 0x4ae   :  { %1601 = vmatmul.msk.bf16.gmra.mxu2 %vm515_vm14, %v1250_v54  ;;  %v1200_v3 = vmul.f32 %v1183_v9, %v1134_v19 }
 0x4b0   :  { %v1208_v32 = vpack.c.bf16 %v1200_v3, %v1200_v3 }
 0x4b2   :  { %v1244_v6 = vunpack.c.l.b16 %v1208_v32 }
 0x4b5   :  { %v1185_v31 = vpop.f32.mrf.mxu1 }
 0x4b6   :  { %v1201_v48 = vmul.f32 %v1185_v31, %v1136_v15 }
 0x4b8   :  { %v1209_v49 = vpack.c.bf16 %v1201_v48, %v1201_v48 }
 0x4ba   :  { %v1245_v63 = vunpack.c.l.b16 %v1209_v49 }
 0x4bc   :  { %v1251_v5 = vpack.c.b16 %v1245_v63, %v1244_v6 }
 0x4be   :  { %1602 = vmatmul.msk.bf16.gmra.mxu2 %vm515_vm14, %v1251_v5 }
 0x4f1   :  { %v1323_v13 = vpop.f32.mrf.mxu2 }
 0x4f2   :  { %v1324_v20 = vadd.f32 %v2446_v57, %v1323_v13 }
 0x4f9   :  { %v1325_v25 = vpop.f32.mrf.mxu2 }
 0x4fa   :  { %v1326_v26 = vadd.f32 %v2446_v57, %v1325_v25 }
 0x501   :  { %v1328_v8 = vpop.f32.mrf.mxu2 }
 0x502   :  { %v1329_v7 = vadd.f32 %v2446_v57, %v1328_v8 }
 0x509   :  { %v2432_v39 = vpop.f32.mrf.mxu2 }
 0x50a   :  { %v1331_v54 = vadd.f32 %v2446_v57, %v2432_v39 }
 0x511   :  { %v2434_v61 = vpop.f32.mrf.mxu2 }
 0x519   :  { %v1094_v40 = vpop.f32.mrf.mxu0  ;;  %v2436_v27 = vpop.f32.mrf.mxu2 }
 0x51a   :  { %v1108_v4 = vmax.f32 %v1094_v40, 1e-20 }
 0x51c   :  { %1769 = vrcp.f32 %v1108_v4 }
 0x51f   :  { %v1139_v21 = vpop.f32.mrf.mxu3 }
 0x521   :  { %v1096_v34 = vpop.f32.mrf.mxu0  ;;  %v2438_v38 = vpop.f32.mrf.mxu2 }
 0x522   :  { %v1109_v42 = vmax.f32 %v1096_v34, 1e-20  ;;  %v1770_v43 = vpop.eup %1769 }
 0x524   :  { %1771 = vrcp.f32 %v1109_v42 }
 0x527   :  { %v1141_v55 = vpop.f32.mrf.mxu3 }
 0x529   :  { %v1099_v2 = vpop.f32.mrf.mxu0  ;;  %v2440_v23 = vpop.f32.mrf.mxu2 }
 0x52a   :  { %v1772_v47 = vpop.eup %1771  ;;  %v1110_v14 = vmax.f32 %v1099_v2, 1e-20  ;;  %v1334_v2 = vadd.f32 %v2446_v57, %v2434_v61  ;;  %v1339_v61 = vadd.f32 %v2446_v57, %v2438_v38 }
 0x52b   :  { %v1151_v56 = vpack.c.bf16 %v1772_v47, %v1770_v43 }
 0x52c   :  { %1773 = vrcp.f32 %v1110_v14  ;;  %v1341_v14 = vadd.f32 %v2446_v57, %v2440_v23 }
 0x52d   :  { %1579 = vmatmul.msk.bf16.gmra.mxu1 %vm768_vm0, %v1151_v56 }
 0x52f   :  { %v1144_v18 = vpop.f32.mrf.mxu3 }
 0x531   :  { %v1101_v50 = vpop.f32.mrf.mxu0  ;;  %v1343_v51 = vpop.f32.mrf.mxu2 }
 0x532   :  { %v1111_v11 = vmax.f32 %v1101_v50, 1e-20  ;;  %v1344_v52 = vadd.f32 %v2446_v57, %v1343_v51  ;;  %v1774_v44 = vpop.eup %1773 }
 0x534   :  { %1775 = vrcp.f32 %v1111_v11  ;;  %1371 = vrot.lane.b32.xlu0 %v1344_v52, %s1804_s1  ;;  %v1336_v11 = vadd.f32 %v2446_v57, %v2436_v27 }
 0x537   :  { %v1146_v31 = vpop.f32.mrf.mxu3 }
 0x539   :  { %v1345_v53 = vpop.f32.mrf.mxu2 }
 0x53a   :  { %v1776_v45 = vpop.eup %1775  ;;  %v1346_v58 = vadd.f32 %v2446_v57, %v1345_v53 }
 0x53b   :  { %v1152_v59 = vpack.c.bf16 %v1776_v45, %v1774_v44 }
 0x53c   :  { %1373 = vrot.lane.b32.xlu1 %v1346_v58, %s1804_s1 }
 0x53d   :  { %1580 = vmatmul.msk.bf16.gmra.mxu1 %vm768_vm0, %v1152_v59 }
 0x541   :  { %v1348_v60 = vpop.f32.mrf.mxu2 }
 0x542   :  { %v1349_v62 = vadd.f32 %v2446_v57, %v1348_v60 }
 0x544   :  { %1375 = vrot.lane.b32.xlu2 %v1349_v62, %s1804_s1 }
 0x549   :  { %v1350_v0 = vpop.f32.mrf.mxu2 }
 0x54a   :  { %v1351_v1 = vadd.f32 %v2446_v57, %v1350_v0 }
 0x54c   :  { %1377 = vrot.lane.b32.xlu0 %v1351_v1, %s1804_s1 }
 0x59e   :  { %v1376_v10 = vpop.permute.xlu2 %1375 }
 0x59f   :  { %v1397_v16 = vsel %vm515_vm14, %v1329_v7, %v1376_v10 }
 0x5a0   :  { %1405 = vst [vmem:[#allocation2 + $0x10] sm:$0xff] %v1397_v16 }
 0x5a6   :  { %v1372_v22 = vpop.permute.xlu0 %1371 }
 0x5a7   :  { %v1395_v24 = vsel %vm515_vm14, %v1324_v20, %v1372_v22 }
 0x5a8   :  { %1403 = vst [vmem:[#allocation2] sm:$0xff] %v1395_v24 }
 0x5aa   :  { %v1188_v12 = vpop.f32.mrf.mxu1 }
 0x5ab   :  { %v1202_v35 = vmul.f32 %v1188_v12, %v1139_v21 }
 0x5ad   :  { %v1210_v17 = vpack.c.bf16 %v1202_v35, %v1202_v35 }
 0x5ae   :  { %v1374_v33 = vpop.permute.xlu1 %1373 }
 0x5af   :  { %v1396_v36 = vsel %vm515_vm14, %v1326_v26, %v1374_v33  ;;  %v1246_v46 = vunpack.c.l.b16 %v1210_v17 }
 0x5b0   :  { %1404 = vst [vmem:[#allocation2 + $0x8] sm:$0xff] %v1396_v36 }
 0x5b2   :  { %v1190_v28 = vpop.f32.mrf.mxu1 }
 0x5b3   :  { %v1203_v30 = vmul.f32 %v1190_v28, %v1141_v55 }
 0x5b5   :  { %v1211_v41 = vpack.c.bf16 %v1203_v30, %v1203_v30 }
 0x5b7   :  { %v1247_v37 = vunpack.c.l.b16 %v1211_v41 }
 0x5b9   :  { %v1252_v29 = vpack.c.b16 %v1247_v37, %v1246_v46 }
 0x5ba   :  { %v1193_v19 = vpop.f32.mrf.mxu1 }
 0x5bb   :  { %1603 = vmatmul.msk.bf16.gmra.mxu2 %vm515_vm14, %v1252_v29  ;;  %v1204_v3 = vmul.f32 %v1193_v19, %v1144_v18 }
 0x5bd   :  { %v1212_v48 = vpack.c.bf16 %v1204_v3, %v1204_v3 }
 0x5be   :  { %v1378_v9 = vpop.permute.xlu0 %1377 }
 0x5bf   :  { %v1398_v15 = vsel %vm515_vm14, %v1331_v54, %v1378_v9  ;;  %v1248_v63 = vunpack.c.l.b16 %v1212_v48 }
 0x5c0   :  { %1406 = vst [vmem:[#allocation2 + $0x18] sm:$0xff] %v1398_v15 }
 0x5c2   :  { %v1195_v32 = vpop.f32.mrf.mxu1 }
 0x5c3   :  { %v1205_v49 = vmul.f32 %v1195_v32, %v1146_v31 }
 0x5c5   :  { %v1213_v6 = vpack.c.bf16 %v1205_v49, %v1205_v49 }
 0x5c7   :  { %v1249_v5 = vunpack.c.l.b16 %v1213_v6 }
 0x5c9   :  { %v1253_v13 = vpack.c.b16 %v1249_v5, %v1248_v63 }
 0x5cb   :  { %1604 = vmatmul.msk.bf16.gmra.mxu2 %vm515_vm14, %v1253_v13 }
 0x63e   :  { %v1353_v25 = vpop.f32.mrf.mxu2 }
 0x63f   :  { %v1354_v8 = vadd.f32 %v2446_v57, %v1353_v25 }
 0x641   :  { %1379 = vrot.lane.b32.xlu2 %v1354_v8, %s1804_s1 }
 0x646   :  { %v1355_v39 = vpop.f32.mrf.mxu2 }
 0x647   :  { %v1356_v40 = vadd.f32 %v2446_v57, %v1355_v39 }
 0x649   :  { %1381 = vrot.lane.b32.xlu1 %v1356_v40, %s1804_s1 }
 0x64e   :  { %v1358_v4 = vpop.f32.mrf.mxu2 }
 0x64f   :  { %v1359_v34 = vadd.f32 %v2446_v57, %v1358_v4 }
 0x651   :  { %1383 = vrot.lane.b32.xlu0 %v1359_v34, %s1804_s1 }
 0x656   :  { %v1360_v42 = vpop.f32.mrf.mxu2 }
 0x657   :  { %v1361_v43 = vadd.f32 %v2446_v57, %v1360_v42 }
 0x659   :  { %1385 = vrot.lane.b32.xlu2 %v1361_v43, %s1804_s1 }
 0x69b   :  { %v1380_v47 = vpop.permute.xlu2 %1379 }
 0x69c   :  { %v1399_v56 = vsel %vm515_vm14, %v1334_v2, %v1380_v47 }
 0x69d   :  { %1407 = vst [vmem:[#allocation2 + $0x20] sm:$0xff] %v1399_v56 }
 0x6b3   :  { %v1386_v50 = vpop.permute.xlu2 %1385 }
 0x6b4   :  { %v1402_v51 = vsel %vm515_vm14, %v1341_v14, %v1386_v50 }
 0x6b5   :  { %1410 = vst [vmem:[#allocation2 + $0x38] sm:$0xff] %v1402_v51 }
 0x6bb   :  { %v1382_v52 = vpop.permute.xlu1 %1381 }
 0x6bc   :  { %v1400_v44 = vsel %vm515_vm14, %v1336_v11, %v1382_v52 }
 0x6bd   :  { %1408 = vst [vmem:[#allocation2 + $0x28] sm:$0xff] %v1400_v44 }
 0x6c3   :  { %v1384_v23 = vpop.permute.xlu0 %1383 }
 0x6c4   :  { %v1401_v53 = vsel %vm515_vm14, %v1339_v61, %v1384_v23 }
 0x6c5   :  { %1409 = vst [vmem:[#allocation2 + $0x30] sm:$0xff] %v1401_v53 }
 0x6c6   :  { %1423 = dma.vmem_to_hbm [thread:$0]  %s1416_s2, 1024, %s1418_s30, [#allocation3], %s1806_s14, %s1806_s14, %s1807_s15  }
 0x6c7   :  { %1801 = dma.done.wait [#allocation3], 1024  }
 0x6c8   :  { %1802 = vsyncadd [#allocation3], 4294966272 }
 0x6c9   :  { %1428 = vsyncpa [#allocation3], 1 }

</bundles_post_ra>
